<compile_context>
chip_gen: v5e
topology: v5e:2x2
jax: 0.10.0
libtpu: 0.0.40
codegen_flags: <defaults>
</compile_context>

<pallas_src>
import jax
import jax.numpy as jnp
from jax.experimental import pallas as pl
from jax.experimental.pallas import tpu as pltpu

HIDDEN = 128
BN_EPS = 1e-5
COS_EPS = 1e-8


def _pae_kernel(x_ref, w1_ref, b1_ref, w2_ref, b2_ref, out_ref):
    # x_ref:  [1, 2*TM, D] bf16  (rows 0..TM-1 = x1 tile, rows TM..2TM-1 = x2 tile)
    # w1_ref: [D, H] bf16, b1_ref: [1, H] f32
    # w2_ref: [H, H] bf16 (BN folded), b2_ref: [1, H] f32 (BN folded)
    # out_ref: [1, TM//128, 128] f32 (lane-dense edge-weight slab)
    xs = x_ref[0]                      # [2*TM, D] bf16
    w1 = w1_ref[...]
    b1 = b1_ref[...]
    w2 = w2_ref[...]
    b2 = b2_ref[...]

    # Single matmul pair covers both halves (stacked along rows).
    h = jnp.dot(xs, w1, preferred_element_type=jnp.float32) + b1
    h = jnp.maximum(h, 0.0)            # ReLU (BatchNorm folded into w2/b2)
    # Dropout: identity in eval mode.
    h = jnp.dot(h.astype(jnp.bfloat16), w2, preferred_element_type=jnp.float32) + b2

    tm = h.shape[0] // 2
    h1 = h[:tm]                        # [TM, H] f32
    h2 = h[tm:]                        # [TM, H] f32

    num = jnp.sum(h1 * h2, axis=-1)    # [TM]
    sq1 = jnp.sum(h1 * h1, axis=-1)
    sq2 = jnp.sum(h2 * h2, axis=-1)
    # torch cosine_similarity eps clamp: max(n, eps) == sqrt(max(n^2, eps^2)).
    eps2 = COS_EPS * COS_EPS
    inv = jax.lax.rsqrt(jnp.maximum(sq1, eps2)) * jax.lax.rsqrt(jnp.maximum(sq2, eps2))
    cos = num * inv

    out_ref[...] = ((cos + 1.0) * 0.5).reshape(out_ref.shape).astype(out_ref.dtype)


def _pick_tile_m(E):
    """Large tiles to amortize ~0.35us/grid-step, but keep >=2 steps when possible
    (v7x has 2 TensorCores sharing the 'parallel' grid axis)."""
    e128 = pl.cdiv(E, 128) * 128
    half = max(128, (e128 // 2) // 128 * 128)
    return min(1024, half)


def pae_edge_weight(edgenet_input, params, *, tile_m=None):
    """edgenet_input: [E, 2*D] float32 -> edge_weight: [E] float32."""
    E, two_d = edgenet_input.shape
    w1, b1, gamma, beta, mean, var, w2, b2 = params
    D = w1.shape[0]
    assert two_d == 2 * D

    if tile_m is None:
        tile_m = _pick_tile_m(E)
    assert tile_m % 128 == 0
    n_tiles = pl.cdiv(E, tile_m)
    e_pad = n_tiles * tile_m

    # Fold eval-mode BatchNorm1d into the second Linear.
    s = gamma * jax.lax.rsqrt(var + BN_EPS)          # (1, H)
    w2f = w2 * s.reshape(-1, 1)                      # diag(s) @ W2
    b2f = (beta - mean * s) @ w2 + b2                # (1, H)

    # Split halves, pad rows to a multiple of tile_m, stack x1/x2 row-wise per tile.
    x1 = edgenet_input[:, :D]
    x2 = edgenet_input[:, D:]
    if e_pad != E:
        pad = ((0, e_pad - E), (0, 0))
        x1 = jnp.pad(x1, pad)
        x2 = jnp.pad(x2, pad)
    xs = jnp.concatenate(
        [x1.reshape(n_tiles, tile_m, D), x2.reshape(n_tiles, tile_m, D)], axis=1
    ).astype(jnp.bfloat16)                           # (n_tiles, 2*tile_m, D)

    w1_bf = w1.astype(jnp.bfloat16)
    w2_bf = w2f.astype(jnp.bfloat16)

    const2d = lambda shape: pl.BlockSpec(shape, lambda i: (0, 0))  # constant block index -> not re-DMA'd per step

    grid_spec = pltpu.PrefetchScalarGridSpec(
        num_scalar_prefetch=0,
        grid=(n_tiles,),
        in_specs=[
            pl.BlockSpec((1, 2 * tile_m, D), lambda i: (i, 0, 0)),   # stacked x tile
            const2d((D, HIDDEN)),                                    # W1  (bf16)
            const2d((1, HIDDEN)),                                    # b1
            const2d((HIDDEN, HIDDEN)),                               # W2' (bf16, BN folded)
            const2d((1, HIDDEN)),                                    # b2' (BN folded)
        ],
        out_specs=pl.BlockSpec((1, tile_m // 128, 128), lambda i: (i, 0, 0)),
    )

    out = pl.pallas_call(
        _pae_kernel,
        out_shape=jax.ShapeDtypeStruct((n_tiles, tile_m // 128, 128), jnp.float32),
        grid_spec=grid_spec,
        compiler_params=pltpu.CompilerParams(
            dimension_semantics=("parallel",)),
    )(xs, w1_bf, b1, w2_bf, b2f)

    # torch.squeeze(edge_weight): lane-dense slab -> [E]
    return out.reshape(-1)[:E]


def init_params(key, input_dim):
    """Deterministic init mirroring EV_GCN.model_init (kaiming_normal_ weights, zero bias)."""
    k1, k2 = jax.random.split(key)
    # PyTorch kaiming_normal_ (fan_in, gain=sqrt(2)) on weight of shape (out, in)
    std1 = (2.0 / input_dim) ** 0.5
    std2 = (2.0 / HIDDEN) ** 0.5
    w1_t = jax.random.normal(k1, (HIDDEN, input_dim), jnp.float32) * std1
    w2_t = jax.random.normal(k2, (HIDDEN, HIDDEN), jnp.float32) * std2
    w1 = w1_t.T                                   # store (in, out)
    w2 = w2_t.T
    b1 = jnp.zeros((1, HIDDEN), jnp.float32)
    b2 = jnp.zeros((1, HIDDEN), jnp.float32)
    gamma = jnp.ones((1, HIDDEN), jnp.float32)    # BatchNorm1d defaults
    beta = jnp.zeros((1, HIDDEN), jnp.float32)
    mean = jnp.zeros((1, HIDDEN), jnp.float32)
    var = jnp.ones((1, HIDDEN), jnp.float32)
    return (w1, b1, gamma, beta, mean, var, w2, b2)


def ev_gcn_forward(edge_index, edgenet_input, params):
    # EV_GCN.forward: edge_weight = squeeze(edge_net(edgenet_input)); return edge_weight
    # (edge_index is accepted but unused by the forward pass.)
    del edge_index
    return pae_edge_weight(edgenet_input, params)


def _reference(edgenet_input, params):
    """Pure-JAX f32 reference (unfolded BN) for sanity checking."""
    w1, b1, gamma, beta, mean, var, w2, b2 = params
    d = w1.shape[0]
    x1, x2 = edgenet_input[:, :d], edgenet_input[:, d:]

    def mlp(x):
        h = jnp.maximum(x @ w1 + b1, 0.0)
        h = (h - mean) / jnp.sqrt(var + BN_EPS) * gamma + beta
        return h @ w2 + b2

    h1, h2 = mlp(x1), mlp(x2)
    num = jnp.sum(h1 * h2, axis=-1)
    n1 = jnp.sqrt(jnp.sum(h1 * h1, axis=-1))
    n2 = jnp.sqrt(jnp.sum(h2 * h2, axis=-1))
    cos = num / (jnp.maximum(n1, COS_EPS) * jnp.maximum(n2, COS_EPS))
    return (cos + 1.0) * 0.5


if __name__ == "__main__":
    key = jax.random.PRNGKey(0)
    k_x, k_p, k_e = jax.random.split(key, 3)

    # Small shapes: E = 300 edges (non-multiple of 128 to exercise the padded tail),
    # edgenet_input_dim = 16 (so PAE input_dim = 8).
    E = 300
    edgenet_input_dim = 16
    input_dim = edgenet_input_dim // 2

    edgenet_input = jax.random.normal(k_x, (E, edgenet_input_dim), jnp.float32)
    edge_index = jax.random.randint(k_e, (2, E), 0, 64)   # unused by forward
    params = init_params(k_p, input_dim)

    edge_weight = ev_gcn_forward(edge_index, edgenet_input, params)
    edge_weight = jax.block_until_ready(edge_weight)

    ref = _reference(edgenet_input, params)
    assert edge_weight.shape == (E,)
    # bf16 MXU operands => ~1e-3-level relative error vs the f32 reference.
    assert jnp.allclose(edge_weight, ref, atol=2e-2, rtol=2e-2)

    print("KERNEL_OK")
</pallas_src>

<mosaic_0001>
module attributes {stable_mosaic.version = 11 : i64} {
  func.func @_pae_kernel(%arg0: i32, %arg1: memref<1x256x8xbf16, #tpu.memory_space<vmem>>, %arg2: memref<8x128xbf16, #tpu.memory_space<vmem>>, %arg3: memref<1x128xf32, #tpu.memory_space<vmem>>, %arg4: memref<128x128xbf16, #tpu.memory_space<vmem>>, %arg5: memref<1x128xf32, #tpu.memory_space<vmem>>, %arg6: memref<1x1x128xf32, #tpu.memory_space<vmem>>) attributes {dimension_semantics = [#tpu.dimension_semantics<parallel>], iteration_bounds = array<i64: 3>, scalar_prefetch = 0 : i64, scratch_operands = 0 : i64, tpu.core_type = #tpu.core_type<tc>, window_params = [{transform_indices = @transform_0, window_bounds = array<i64: 1, 256, 8>}, {pipeline_mode = #tpu.pipeline_mode<synchronous>, transform_indices = @transform_1, window_bounds = array<i64: 8, 128>}, {pipeline_mode = #tpu.pipeline_mode<synchronous>, transform_indices = @transform_2, window_bounds = array<i64: 1, 128>}, {pipeline_mode = #tpu.pipeline_mode<synchronous>, transform_indices = @transform_3, window_bounds = array<i64: 128, 128>}, {pipeline_mode = #tpu.pipeline_mode<synchronous>, transform_indices = @transform_4, window_bounds = array<i64: 1, 128>}, {transform_indices = @transform_5, window_bounds = array<i64: 1, 1, 128>}]} {
    %c0 = arith.constant 0 : index
    %c0_0 = arith.constant 0 : index
    %c0_1 = arith.constant 0 : index
    %0 = vector.load %arg1[%c0, %c0_0, %c0_1] : memref<1x256x8xbf16, #tpu.memory_space<vmem>>, vector<1x256x8xbf16>
    %1 = vector.shape_cast %0 : vector<1x256x8xbf16> to vector<256x8xbf16>
    %c0_2 = arith.constant 0 : index
    %c0_3 = arith.constant 0 : index
    %2 = vector.load %arg2[%c0_2, %c0_3] : memref<8x128xbf16, #tpu.memory_space<vmem>>, vector<8x128xbf16>
    %c0_4 = arith.constant 0 : index
    %c0_5 = arith.constant 0 : index
    %3 = vector.load %arg3[%c0_4, %c0_5] : memref<1x128xf32, #tpu.memory_space<vmem>>, vector<1x128xf32>
    %c0_6 = arith.constant 0 : index
    %c0_7 = arith.constant 0 : index
    %4 = vector.load %arg4[%c0_6, %c0_7] : memref<128x128xbf16, #tpu.memory_space<vmem>>, vector<128x128xbf16>
    %c0_8 = arith.constant 0 : index
    %c0_9 = arith.constant 0 : index
    %5 = vector.load %arg5[%c0_8, %c0_9] : memref<1x128xf32, #tpu.memory_space<vmem>>, vector<1x128xf32>
    %cst = arith.constant dense<0.000000e+00> : vector<256x128xf32>
    %6 = tpu.matmul %1, %2, %cst {dimension_numbers = #tpu.dot_dimension_numbers<[1], [0], [0], [1], [0, 0, 1, 1], [], []>} : vector<256x8xbf16>, vector<8x128xbf16>, vector<256x128xf32> -> vector<256x128xf32>
    %7 = vector.broadcast %3 : vector<1x128xf32> to vector<256x128xf32>
    %8 = arith.addf %6, %7 : vector<256x128xf32>
    %cst_10 = arith.constant 0.000000e+00 : f32
    %9 = vector.broadcast %cst_10 : f32 to vector<256x128xf32>
    %10 = arith.maximumf %8, %9 : vector<256x128xf32>
    %11 = arith.truncf %10 : vector<256x128xf32> to vector<256x128xbf16>
    %cst_11 = arith.constant dense<0.000000e+00> : vector<256x128xf32>
    %12 = tpu.matmul %11, %4, %cst_11 {dimension_numbers = #tpu.dot_dimension_numbers<[1], [0], [0], [1], [0, 0, 1, 1], [], []>} : vector<256x128xbf16>, vector<128x128xbf16>, vector<256x128xf32> -> vector<256x128xf32>
    %13 = vector.broadcast %5 : vector<1x128xf32> to vector<256x128xf32>
    %14 = arith.addf %12, %13 : vector<256x128xf32>
    %15 = vector.extract_strided_slice %14 {offsets = [0, 0], sizes = [128, 128], strides = [1, 1]} : vector<256x128xf32> to vector<128x128xf32>
    %16 = vector.extract_strided_slice %14 {offsets = [128, 0], sizes = [128, 128], strides = [1, 1]} : vector<256x128xf32> to vector<128x128xf32>
    %17 = arith.mulf %15, %16 : vector<128x128xf32>
    %cst_12 = arith.constant dense<0.000000e+00> : vector<128xf32>
    %18 = vector.multi_reduction <add>, %17, %cst_12 [1] : vector<128x128xf32> to vector<128xf32>
    %19 = arith.mulf %15, %15 : vector<128x128xf32>
    %cst_13 = arith.constant dense<0.000000e+00> : vector<128xf32>
    %20 = vector.multi_reduction <add>, %19, %cst_13 [1] : vector<128x128xf32> to vector<128xf32>
    %21 = arith.mulf %16, %16 : vector<128x128xf32>
    %cst_14 = arith.constant dense<0.000000e+00> : vector<128xf32>
    %22 = vector.multi_reduction <add>, %21, %cst_14 [1] : vector<128x128xf32> to vector<128xf32>
    %cst_15 = arith.constant 1.000000e-16 : f32
    %23 = vector.broadcast %cst_15 : f32 to vector<128xf32>
    %24 = arith.maximumf %20, %23 : vector<128xf32>
    %25 = math.rsqrt %24 : vector<128xf32>
    %cst_16 = arith.constant 1.000000e-16 : f32
    %26 = vector.broadcast %cst_16 : f32 to vector<128xf32>
    %27 = arith.maximumf %22, %26 : vector<128xf32>
    %28 = math.rsqrt %27 : vector<128xf32>
    %29 = arith.mulf %25, %28 : vector<128xf32>
    %30 = arith.mulf %18, %29 : vector<128xf32>
    %cst_17 = arith.constant 1.000000e+00 : f32
    %31 = vector.broadcast %cst_17 : f32 to vector<128xf32>
    %32 = arith.addf %30, %31 : vector<128xf32>
    %cst_18 = arith.constant 5.000000e-01 : f32
    %33 = vector.broadcast %cst_18 : f32 to vector<128xf32>
    %34 = arith.mulf %32, %33 : vector<128xf32>
    %35 = vector.shape_cast %34 : vector<128xf32> to vector<1x1x128xf32>
    %c0_19 = arith.constant 0 : index
    %c0_20 = arith.constant 0 : index
    %c0_21 = arith.constant 0 : index
    %36 = vector.load %arg6[%c0_19, %c0_20, %c0_21] : memref<1x1x128xf32, #tpu.memory_space<vmem>>, vector<1x1x128xf32>
    tpu.vector_store %arg6[%c0_19, %c0_20, %c0_21], %35 {strides = array<i32>} : memref<1x1x128xf32, #tpu.memory_space<vmem>>, vector<1x1x128xf32>,
    return
  }
  func.func @transform_0(%arg0: i32) -> (i32, i32, i32) {
    %c0_i32 = arith.constant 0 : i32
    %c0_i32_0 = arith.constant 0 : i32
    %c0_i32_1 = arith.constant 0 : i32
    return %arg0, %c0_i32, %c0_i32_0 : i32, i32, i32
  }
  func.func @transform_1(%arg0: i32) -> (i32, i32) {
    %c0_i32 = arith.constant 0 : i32
    %c0_i32_0 = arith.constant 0 : i32
    %c0_i32_1 = arith.constant 0 : i32
    return %c0_i32, %c0_i32_0 : i32, i32
  }
  func.func @transform_2(%arg0: i32) -> (i32, i32) {
    %c0_i32 = arith.constant 0 : i32
    %c0_i32_0 = arith.constant 0 : i32
    %c0_i32_1 = arith.constant 0 : i32
    return %c0_i32, %c0_i32_0 : i32, i32
  }
  func.func @transform_3(%arg0: i32) -> (i32, i32) {
    %c0_i32 = arith.constant 0 : i32
    %c0_i32_0 = arith.constant 0 : i32
    %c0_i32_1 = arith.constant 0 : i32
    return %c0_i32, %c0_i32_0 : i32, i32
  }
  func.func @transform_4(%arg0: i32) -> (i32, i32) {
    %c0_i32 = arith.constant 0 : i32
    %c0_i32_0 = arith.constant 0 : i32
    %c0_i32_1 = arith.constant 0 : i32
    return %c0_i32, %c0_i32_0 : i32, i32
  }
  func.func @transform_5(%arg0: i32) -> (i32, i32, i32) {
    %c0_i32 = arith.constant 0 : i32
    %c0_i32_0 = arith.constant 0 : i32
    %c0_i32_1 = arith.constant 0 : i32
    return %arg0, %c0_i32, %c0_i32_0 : i32, i32, i32
  }
}

</mosaic_0001>

<bundles_post_ra>
// kernel: tpu_custom_call.1
= control target key start
LH: loop header
LB: loop body
LE: loop exit
PB: predicated region body
PF: predicated region fallthrough
CT: control target
= control target key end

     0   :  { %10 = vsyncpa [#allocation3], 0  ;;  %s2463_s0 = inlined_call_operand.vmem [shape: bf16[3,256,8], index: 0, kind: input, shape index: {}]   ;;  %s2464_s1 = inlined_call_operand.vmem [shape: bf16[8,128], index: 1, kind: input, shape index: {}]   ;;  %s2465_s2 = inlined_call_operand.vmem [shape: f32[1,128], index: 2, kind: input, shape index: {}]   ;;  %s2466_s3 = inlined_call_operand.vmem [shape: bf16[128,128], index: 3, kind: input, shape index: {}]   ;;  %s2467_s4 = inlined_call_operand.vmem [shape: f32[1,128], index: 4, kind: input, shape index: {}]   ;;  %s2468_s5 = inlined_call_operand.hbm [shape: f32[3,1,128], index: 5, kind: output, shape index: {}]  }
   0x1   :  { %12 = vsyncpa [#allocation3 + $0x1], 0  ;;  %s1749_s18 = smov 0   ;;  %s1751_s19 = smov 0  }
   0x2   :  { %s1753_s20 = smov 0   ;;  %s1755_s21 = smov 0  }
   0x3 LB: > { %s1770_s22 = sadd.s32 4294967295, %s1717_s21   ;;  %s1396_s23 = sadd.s32 4294967294, %s1717_s21   ;;  %s1717_s21 = sphi %s1755_s21, %s2492_s21   ;;  %s1713_s20 = sphi %s1753_s20, %s2491_s20   ;;  %s1709_s19 = sphi %s1751_s19, %s2490_s19   ;;  %s1705_s18 = sphi %s1749_s18, %s2489_s18  }
   0x4   : > { %s1774_s24 = sadd.s32 1, %s1717_s21   ;;  %s135_s25 = sadd.s32 1, %s1713_s20 }
   0x5   : > { %s132_s26 = ssub.s32 %s1717_s21, %s1774_s24  ;;  %p145_p0 = scmp.ne.s32.totalorder %s1713_s20, %s1709_s19 }
   0x6   : > { %p133_p1 = scmp.eq.s32.totalorder %s132_s26, 0  ;;  %p146_p2 = scmp.eq.s32.totalorder %s1770_s22, 2 }
   0x7   : > { %p151_p3 = scmp.ne.s32.totalorder %s1709_s19, %s1705_s18  ;;  %p152_p4 = scmp.eq.s32.totalorder %s1396_s23, 2 }
   0x8   : > { %s1785_s27 = scalar_select %p133_p1, %s1713_s20, %s135_s25  }
   0x9   : > { %p1787_p5 = por %p146_p2, %p145_p0  ;;  %p1791_p6 = por %p152_p4, %p151_p3 }
   0xa   : > { %p1399_p7 = scmp.ge.s32.totalorder %s1717_s21, 1  ;;  %p190_p8 = scmp.lt.s32.totalorder %s1717_s21, 4 }
   0xc   : > { %p191_p9 = pnand %p1399_p7, %p190_p8 }
   0xd   : > { %p217_p10 = scmp.lt.s32.totalorder (!%p191_p9), %s1770_s22, 2  ;;  %s215_s16 = sand.u32 (!%p191_p9), 1, %s1709_s19  }
   0xe   : > { %194 = sbr.rel (%p191_p9) target bundleno = 708 (0x2c4), region = 40  ;;  %s1337_s25 = scalar_lea.hbm (!%p191_p9), %s2468_s5, %s1770_s22 }
   0xf   : > { %s216_s26 = scalar_lea.vmem (!%p191_p9), [#allocation2], %s215_s16  ;;  %s1341_s6 = sshll.u32 (!%p191_p9), %s1337_s25, 4  ;;  %s1342_s6 = int_to_ptr.hbm [resolvable:$true] %s1341_s6 }
  0x10   : > { %s1339_s30 = sshll.u32 (!%p191_p9), %s216_s26, 4  ;;  %s1675_s12 = scalar_lea.hbm (!%p191_p9), %s2468_s5, 3  ;;  %s1340_s30 = int_to_ptr.vmem [resolvable:$true] %s1339_s30 }
  0x13   : > { %v255_v0 = vld [vmem:[%s2464_s1] sm:$0xf]  ;;  %vm406_vm0 = vcmask 1043456   ;;  %s218_s7 = scalar_select %p217_p10, %s1770_s22, 2  ;;  %vm357_vm1 = vcmask 64512   ;;  %v1540_v7 = vld [vmem:[%s2466_s3 + $0x38] sm:$0xff] }
  0x14   : > { %v408_v1 = vsel %vm406_vm0, %v255_v0, 0  ;;  %598 = vmatpush.bf16.msra.mxu1 %v1540_v7  ;;  %1542 = vmatpush.bf16.msra.mxu2 %v1540_v7  ;;  %v1539_v9 = vld [vmem:[%s2466_s3 + $0x30] sm:$0xff]  ;;  %v1538_v10 = vld [vmem:[%s2466_s3 + $0x28] sm:$0xff]  ;;  %v1537_v11 = vld [vmem:[%s2466_s3 + $0x20] sm:$0xff] }
  0x15   : > { %417 = vmatpush.bf16.msra.mxu0 %v408_v1  ;;  %1541 = vmatpush.bf16.msra.mxu3 %v408_v1  ;;  %s1516_s8 = sshll.u32 %s218_s7, 7  ;;  %v1536_v12 = vld [vmem:[%s2466_s3 + $0x18] sm:$0xff]  ;;  %v1535_v14 = vld [vmem:[%s2466_s3 + $0x10] sm:$0xff]  ;;  %v1534_v16 = vld [vmem:[%s2466_s3 + $0x8] sm:$0xff]  ;;  %s1329_s7 = scalar_lea.sflag [#allocation3], %s215_s16 }
  0x16   : > { %s1805_s11 = scalar_lea.vmem %s2463_s0, %s1516_s8  ;;  %v1533_v17 = vld [vmem:[%s2466_s3] sm:$0xff]  ;;  %s1669_s8 = sshra.s32 %s1342_s6, 4  ;;  %s1670_s8 = int_to_ptr.hbm [resolvable:$true] %s1669_s8 }
  0x17   : > { %v1517_v2 = vld [vmem:[%s1805_s11] sm:$0xff]  ;;  %v1518_v3 = vld [vmem:[%s1805_s11 + $0x8] sm:$0xff]  ;;  %v1519_v4 = vld [vmem:[%s1805_s11 + $0x10] sm:$0xff]  ;;  %s1671_s22 = scalar_lea.hbm %s1670_s8, 1  ;;  %p1676_p0 = scmp.lt.s32.totalorder %s1670_s8, %s2468_s5 }
  0x18   : > { %1466 = vmatmul.msk.bf16.vlgmr.msra.gmra.mxu0 %vm357_vm1, %v1517_v2  ;;  %v1520_v5 = vld [vmem:[%s1805_s11 + $0x18] sm:$0xff]  ;;  %v1521_v6 = vld [vmem:[%s1805_s11 + $0x20] sm:$0xff]  ;;  %v1522_v8 = vld [vmem:[%s1805_s11 + $0x28] sm:$0xff]  ;;  %599 = vmatpush.bf16.msra.mxu1 %v1539_v9  ;;  %p1672_p11 = scmp.ne.s32.totalorder %s1670_s8, %s1671_s22  ;;  %p1677_p1 = scmp.lt.s32.totalorder %s1675_s12, %s1671_s22 }
  0x19   : > { %1543 = vmatpush.bf16.msra.mxu2 %v1539_v9  ;;  %v1523_v13 = vld [vmem:[%s1805_s11 + $0x30] sm:$0xff]  ;;  %v1526_v15 = vld [vmem:[%s1805_s11 + $0x48] sm:$0xff]  ;;  %v1524_v18 = vld [vmem:[%s1805_s11 + $0x38] sm:$0xff] }
  0x1a   : > { %1475 = vmatmul.msk.bf16.vlgmr.msra.gmra.mxu3 %vm357_vm1, %v1526_v15  ;;  %v1527_v19 = vld [vmem:[%s1805_s11 + $0x50] sm:$0xff]  ;;  %v1525_v20 = vld [vmem:[%s1805_s11 + $0x40] sm:$0xff]  ;;  %v1528_v23 = vld [vmem:[%s1805_s11 + $0x58] sm:$0xff]  ;;  %p1673_p12 = pnand %p1672_p11, %p1787_p5  ;;  %p1678_p2 = por %p1677_p1, %p1676_p0 }
  0x1b   : > { %v1855_v22 = vld [vmem:[%s2465_s2] ss:$0 sm:$0xff]  ;;  %v1530_v39 = vld [vmem:[%s1805_s11 + $0x68] sm:$0xff]  ;;  %v1531_v47 = vld [vmem:[%s1805_s11 + $0x70] sm:$0xff] }
  0x1c   : > { %600 = vmatpush.bf16.msra.mxu1 %v1538_v10  ;;  %v1529_v31 = vld [vmem:[%s1805_s11 + $0x60] sm:$0xff]  ;;  %v1532_v55 = vld [vmem:[%s1805_s11 + $0x78] sm:$0xff]  ;;  %p1674_p13 = pneg %p1673_p12 }
  0x1d   : > { %1544 = vmatpush.bf16.msra.mxu2 %v1538_v10 }
  0x1e   : > { %p1679_p3 = pnand %p1678_p2, %p1674_p13 }
  0x20   : > { %601 = vmatpush.bf16.msra.mxu1 %v1537_v11 }
  0x21   : > { %1545 = vmatpush.bf16.msra.mxu2 %v1537_v11 }
  0x24   : > { %602 = vmatpush.bf16.msra.mxu1 %v1536_v12 }
  0x25   : > { %1546 = vmatpush.bf16.msra.mxu2 %v1536_v12 }
  0x28   : > { %1467 = vmatmul.msk.bf16.gmra.mxu0 %vm357_vm1, %v1518_v3  ;;  %603 = vmatpush.bf16.msra.mxu1 %v1535_v14 }
  0x29   : > { %1547 = vmatpush.bf16.msra.mxu2 %v1535_v14 }
  0x2a   : > { %1476 = vmatmul.msk.bf16.gmra.mxu3 %vm357_vm1, %v1527_v19 }
  0x2c   : > { %604 = vmatpush.bf16.msra.mxu1 %v1534_v16 }
  0x2d   : > { %1548 = vmatpush.bf16.msra.mxu2 %v1534_v16 }
  0x30   : > { %605 = vmatpush.bf16.msra.mxu1 %v1533_v17 }
  0x31   : > { %1549 = vmatpush.bf16.msra.mxu2 %v1533_v17 }
  0x38   : > { %1468 = vmatmul.msk.bf16.gmra.mxu0 %vm357_vm1, %v1519_v4 }
  0x3a   : > { %1477 = vmatmul.msk.bf16.gmra.mxu3 %vm357_vm1, %v1528_v23 }
  0x48   : > { %1469 = vmatmul.msk.bf16.gmra.mxu0 %vm357_vm1, %v1520_v5 }
  0x4a   : > { %1478 = vmatmul.msk.bf16.gmra.mxu3 %vm357_vm1, %v1529_v31 }
  0x58   : > { %1470 = vmatmul.msk.bf16.gmra.mxu0 %vm357_vm1, %v1521_v6 }
  0x5a   : > { %1479 = vmatmul.msk.bf16.gmra.mxu3 %vm357_vm1, %v1530_v39 }
  0x68   : > { %1471 = vmatmul.msk.bf16.gmra.mxu0 %vm357_vm1, %v1522_v8 }
  0x6a   : > { %1480 = vmatmul.msk.bf16.gmra.mxu3 %vm357_vm1, %v1531_v47 }
  0x78   : > { %1472 = vmatmul.msk.bf16.gmra.mxu0 %vm357_vm1, %v1523_v13 }
  0x7a   : > { %1481 = vmatmul.msk.bf16.gmra.mxu3 %vm357_vm1, %v1532_v55 }
  0x88   : > { %1473 = vmatmul.msk.bf16.gmra.mxu0 %vm357_vm1, %v1524_v18 }
  0x95   : > { %v419_v21 = vpop.f32.mrf.mxu0 }
  0x96   : > { %v420_v24 = vadd.f32 %v1855_v22, %v419_v21 }
  0x98   : > { %1474 = vmatmul.msk.bf16.gmra.mxu0 %vm357_vm1, %v1525_v20  ;;  %v499_v27 = vmax.f32 %v420_v24, 0.0 }
  0x9d   : > { %v421_v25 = vpop.f32.mrf.mxu0  ;;  %v464_v13 = vpop.f32.mrf.mxu3 }
  0x9e   : > { %v422_v26 = vadd.f32 %v1855_v22, %v421_v25 }
  0xa0   : > { %v500_v28 = vmax.f32 %v422_v26, 0.0 }
  0xa2   : > { %v531_v29 = vpack.c.bf16 %v500_v28, %v499_v27  ;;  %v1889_v27 = vld [vmem:[%s2467_s4] ss:$0 sm:$0xff] }
  0xa4   : > { %606 = vmatmul.bf16.vlgmr.msra.gmra.mxu1 %v531_v29 }
  0xa5   : > { %v424_v30 = vpop.f32.mrf.mxu0  ;;  %v466_v17 = vpop.f32.mrf.mxu3 }
  0xa6   : > { %v425_v32 = vadd.f32 %v1855_v22, %v424_v30 }
  0xa8   : > { %v501_v35 = vmax.f32 %v425_v32, 0.0 }
  0xad   : > { %v426_v33 = vpop.f32.mrf.mxu0  ;;  %v469_v23 = vpop.f32.mrf.mxu3 }
  0xae   : > { %v427_v34 = vadd.f32 %v1855_v22, %v426_v33 }
  0xb0   : > { %v502_v36 = vmax.f32 %v427_v34, 0.0 }
  0xb2   : > { %v532_v37 = vpack.c.bf16 %v502_v36, %v501_v35  ;;  %v465_v36 = vadd.f32 %v1855_v22, %v464_v13 }
  0xb4   : > { %611 = vmatmul.bf16.gmra.mxu1 %v532_v37  ;;  %v467_v37 = vadd.f32 %v1855_v22, %v466_v17 }
  0xb5   : > { %v429_v38 = vpop.f32.mrf.mxu0  ;;  %v471_v33 = vpop.f32.mrf.mxu3 }
  0xb6   : > { %v430_v40 = vadd.f32 %v1855_v22, %v429_v38 }
  0xb8   : > { %v503_v43 = vmax.f32 %v430_v40, 0.0 }
  0xbd   : > { %v431_v41 = vpop.f32.mrf.mxu0  ;;  %v474_v40 = vpop.f32.mrf.mxu3 }
  0xbe   : > { %v432_v42 = vadd.f32 %v1855_v22, %v431_v41  ;;  %v517_v41 = vmax.f32 %v465_v36, 0.0 }
  0xc0   : > { %v504_v44 = vmax.f32 %v432_v42, 0.0  ;;  %v518_v42 = vmax.f32 %v467_v37, 0.0 }
  0xc2   : > { %v533_v45 = vpack.c.bf16 %v504_v44, %v503_v43 }
  0xc4   : > { %616 = vmatmul.bf16.gmra.mxu1 %v533_v45  ;;  %v540_v45 = vpack.c.bf16 %v518_v42, %v517_v41 }
  0xc5   : > { %v434_v46 = vpop.f32.mrf.mxu0  ;;  %v476_v47 = vpop.f32.mrf.mxu3 }
  0xc6   : > { %v435_v48 = vadd.f32 %v1855_v22, %v434_v46 }
  0xc8   : > { %v505_v51 = vmax.f32 %v435_v48, 0.0 }
  0xcd   : > { %v436_v49 = vpop.f32.mrf.mxu0 }
  0xce   : > { %v437_v50 = vadd.f32 %v1855_v22, %v436_v49  ;;  %v470_v49 = vadd.f32 %v1855_v22, %v469_v23 }
  0xd0   : > { %v506_v52 = vmax.f32 %v437_v50, 0.0  ;;  %v472_v50 = vadd.f32 %v1855_v22, %v471_v33 }
  0xd2   : > { %v534_v53 = vpack.c.bf16 %v506_v52, %v505_v51 }
  0xd4   : > { %621 = vmatmul.bf16.gmra.mxu1 %v534_v53  ;;  %v519_v53 = vmax.f32 %v470_v49, 0.0 }
  0xd5   : > { %v439_v54 = vpop.f32.mrf.mxu0 }
  0xd6   : > { %v440_v56 = vadd.f32 %v1855_v22, %v439_v54  ;;  %v520_v54 = vmax.f32 %v472_v50, 0.0 }
  0xd8   : > { %v507_v59 = vmax.f32 %v440_v56, 0.0  ;;  %v479_v56 = vpop.f32.mrf.mxu3 }
  0xdd   : > { %v441_v57 = vpop.f32.mrf.mxu0 }
  0xde   : > { %v442_v58 = vadd.f32 %v1855_v22, %v441_v57 }
  0xe0   : > { %v508_v60 = vmax.f32 %v442_v58, 0.0  ;;  %v541_v58 = vpack.c.bf16 %v520_v54, %v519_v53 }
  0xe2   : > { %v535_v61 = vpack.c.bf16 %v508_v60, %v507_v59 }
  0xe4   : > { %626 = vmatmul.bf16.gmra.mxu1 %v535_v61  ;;  %v475_v61 = vadd.f32 %v1855_v22, %v474_v40 }
  0xe5   : > { %v444_v62 = vpop.f32.mrf.mxu0 }
  0xe6   : > { %v445_v63 = vadd.f32 %v1855_v22, %v444_v62  ;;  %v477_v62 = vadd.f32 %v1855_v22, %v476_v47 }
  0xe8   : > { %v509_v2 = vmax.f32 %v445_v63, 0.0 }
  0xed   : > { %v446_v0 = vpop.f32.mrf.mxu0 }
  0xee   : > { %v447_v1 = vadd.f32 %v1855_v22, %v446_v0  ;;  %v481_v0 = vpop.f32.mrf.mxu3 }
  0xf0   : > { %v510_v3 = vmax.f32 %v447_v1, 0.0 }
  0xf2   : > { %v536_v4 = vpack.c.bf16 %v510_v3, %v509_v2  ;;  %v521_v2 = vmax.f32 %v475_v61, 0.0  ;;  %v522_v3 = vmax.f32 %v477_v62, 0.0 }
  0xf4   : > { %631 = vmatmul.bf16.gmra.mxu1 %v536_v4 }
  0xf5   : > { %v449_v5 = vpop.f32.mrf.mxu0 }
  0xf6   : > { %v450_v6 = vadd.f32 %v1855_v22, %v449_v5 }
  0xf8   : > { %v511_v9 = vmax.f32 %v450_v6, 0.0  ;;  %v542_v6 = vpack.c.bf16 %v522_v3, %v521_v2 }
  0xfd   : > { %v451_v7 = vpop.f32.mrf.mxu0 }
  0xfe   : > { %v452_v8 = vadd.f32 %v1855_v22, %v451_v7 }
 0x100   : > { %v512_v10 = vmax.f32 %v452_v8, 0.0  ;;  %v484_v8 = vpop.f32.mrf.mxu3 }
 0x102   : > { %v537_v11 = vpack.c.bf16 %v512_v10, %v511_v9  ;;  %v480_v10 = vadd.f32 %v1855_v22, %v479_v56 }
 0x104   : > { %636 = vmatmul.bf16.gmra.mxu1 %v537_v11  ;;  %v482_v11 = vadd.f32 %v1855_v22, %v481_v0 }
 0x105   : > { %v454_v12 = vpop.f32.mrf.mxu0 }
 0x106   : > { %v455_v14 = vadd.f32 %v1855_v22, %v454_v12 }
 0x108   : > { %v513_v18 = vmax.f32 %v455_v14, 0.0  ;;  %v523_v14 = vmax.f32 %v480_v10, 0.0 }
 0x10d   : > { %v456_v15 = vpop.f32.mrf.mxu0 }
 0x10e   : > { %v457_v16 = vadd.f32 %v1855_v22, %v456_v15  ;;  %v524_v15 = vmax.f32 %v482_v11, 0.0 }
 0x110   : > { %v514_v19 = vmax.f32 %v457_v16, 0.0  ;;  %v486_v16 = vpop.f32.mrf.mxu3 }
 0x112   : > { %v538_v20 = vpack.c.bf16 %v514_v19, %v513_v18  ;;  %v543_v19 = vpack.c.bf16 %v524_v15, %v523_v14 }
 0x114   : > { %641 = vmatmul.bf16.gmra.mxu1 %v538_v20 }
 0x115   : > { %v459_v21 = vpop.f32.mrf.mxu0 }
 0x116   : > { %v460_v24 = vadd.f32 %v1855_v22, %v459_v21 }
 0x118   : > { %v515_v28 = vmax.f32 %v460_v24, 0.0  ;;  %v489_v23 = vpop.f32.mrf.mxu3  ;;  %v485_v24 = vadd.f32 %v1855_v22, %v484_v8 }
 0x11d   : > { %v461_v25 = vpop.f32.mrf.mxu0 }
 0x11e   : > { %v462_v26 = vadd.f32 %v1855_v22, %v461_v25  ;;  %v487_v25 = vadd.f32 %v1855_v22, %v486_v16 }
 0x120   : > { %v516_v29 = vmax.f32 %v462_v26, 0.0 }
 0x121   : > { %v607_v30 = vpop.f32.mrf.mxu1 }
 0x122   : > { %v1892_v31 = vadd.f32 %v1889_v27, %v607_v30  ;;  %v539_v32 = vpack.c.bf16 %v516_v29, %v515_v28  ;;  %v525_v29 = vmax.f32 %v485_v24, 0.0  ;;  %v526_v30 = vmax.f32 %v487_v25, 0.0 }
 0x124   : > { %646 = vmatmul.bf16.vlgmr.msra.gmra.mxu2 %v539_v32  ;;  %v735_v34 = vmul.f32 %v1892_v31, %v1892_v31 }
 0x126   : > { %751 = vadd.xlane.f32.xlu1 %v735_v34  ;;  %v544_v34 = vpack.c.bf16 %v526_v30, %v525_v29 }
 0x129   : > { %v609_v35 = vpop.f32.mrf.mxu1 }
 0x12a   : > { %v1899_v38 = vadd.f32 %v1889_v27, %v609_v35  ;;  %v491_v35 = vpop.f32.mrf.mxu3 }
 0x12b   : > { %v492_v40 = vadd.f32 %v1855_v22, %v491_v35 }
 0x12c   : > { %v736_v39 = vmul.f32 %v1899_v38, %v1899_v38 }
 0x12e   : > { %753 = vadd.xlane.f32.xlu2 %v736_v39  ;;  %v490_v39 = vadd.f32 %v1855_v22, %v489_v23 }
 0x131   : > { %v612_v43 = vpop.f32.mrf.mxu1 }
 0x132   : > { %v1904_v44 = vadd.f32 %v1889_v27, %v612_v43  ;;  %v494_v43 = vpop.f32.mrf.mxu3 }
 0x133   : > { %v495_v54 = vadd.f32 %v1855_v22, %v494_v43 }
 0x134   : > { %651 = vmatmul.bf16.gmra.mxu2 %v540_v45  ;;  %v737_v46 = vmul.f32 %v1904_v44, %v1904_v44  ;;  %v527_v45 = vmax.f32 %v490_v39, 0.0 }
 0x136   : > { %755 = vadd.xlane.f32.xlu0 %v737_v46  ;;  %v528_v46 = vmax.f32 %v492_v40, 0.0 }
 0x138   : > { %v545_v49 = vpack.c.bf16 %v528_v46, %v527_v45 }
 0x139   : > { %v614_v48 = vpop.f32.mrf.mxu1 }
 0x13a   : > { %v1911_v51 = vadd.f32 %v1889_v27, %v614_v48 }
 0x13c   : > { %v738_v52 = vmul.f32 %v1911_v51, %v1911_v51 }
 0x13e   : > { %757 = vadd.xlane.f32.xlu1 %v738_v52  ;;  %v496_v52 = vpop.f32.mrf.mxu3 }
 0x141   : > { %v617_v55 = vpop.f32.mrf.mxu1 }
 0x142   : > { %v1916_v57 = vadd.f32 %v1889_v27, %v617_v55  ;;  %v497_v55 = vadd.f32 %v1855_v22, %v496_v52 }
 0x144   : > { %656 = vmatmul.bf16.gmra.mxu2 %v541_v58  ;;  %v739_v59 = vmul.f32 %v1916_v57, %v1916_v57 }
 0x146   : > { %759 = vadd.xlane.f32.xlu0 %v739_v59  ;;  %v529_v59 = vmax.f32 %v495_v54, 0.0 }
 0x149   : > { %v619_v60 = vpop.f32.mrf.mxu1 }
 0x14a   : > { %v1923_v63 = vadd.f32 %v1889_v27, %v619_v60  ;;  %v530_v60 = vmax.f32 %v497_v55, 0.0 }
 0x14c   : > { %v740_v1 = vmul.f32 %v1923_v63, %v1923_v63  ;;  %v546_v0 = vpack.c.bf16 %v530_v60, %v529_v59 }
 0x14e   : > { %761 = vadd.xlane.f32.xlu2 %v740_v1 }
 0x151   : > { %v622_v4 = vpop.f32.mrf.mxu1 }
 0x152   : > { %v1928_v5 = vadd.f32 %v1889_v27, %v622_v4 }
 0x154   : > { %661 = vmatmul.bf16.gmra.mxu2 %v542_v6  ;;  %v741_v7 = vmul.f32 %v1928_v5, %v1928_v5 }
 0x156   : > { %763 = vadd.xlane.f32.xlu1 %v741_v7 }
 0x159   : > { %v624_v9 = vpop.f32.mrf.mxu1 }
 0x15a   : > { %v1935_v12 = vadd.f32 %v1889_v27, %v624_v9 }
 0x15c   : > { %v742_v13 = vmul.f32 %v1935_v12, %v1935_v12 }
 0x15e   : > { %765 = vadd.xlane.f32.xlu0 %v742_v13 }
 0x161   : > { %v627_v17 = vpop.f32.mrf.mxu1 }
 0x162   : > { %v1940_v18 = vadd.f32 %v1889_v27, %v627_v17 }
 0x164   : > { %666 = vmatmul.bf16.gmra.mxu2 %v543_v19  ;;  %v743_v20 = vmul.f32 %v1940_v18, %v1940_v18 }
 0x166   : > { %767 = vadd.xlane.f32.xlu2 %v743_v20 }
 0x169   : > { %v629_v21 = vpop.f32.mrf.mxu1 }
 0x16a   : > { %v1947_v26 = vadd.f32 %v1889_v27, %v629_v21 }
 0x16c   : > { %v744_v28 = vmul.f32 %v1947_v26, %v1947_v26 }
 0x16e   : > { %769 = vadd.xlane.f32.xlu1 %v744_v28 }
 0x171   : > { %v632_v32 = vpop.f32.mrf.mxu1 }
 0x172   : > { %v1952_v33 = vadd.f32 %v1889_v27, %v632_v32 }
 0x174   : > { %671 = vmatmul.bf16.gmra.mxu2 %v544_v34  ;;  %v745_v36 = vmul.f32 %v1952_v33, %v1952_v33 }
 0x176   : > { %771 = vadd.xlane.f32.xlu0 %v745_v36 }
 0x179   : > { %v634_v37 = vpop.f32.mrf.mxu1 }
 0x17a   : > { %v1959_v41 = vadd.f32 %v1889_v27, %v634_v37 }
 0x17c   : > { %v746_v42 = vmul.f32 %v1959_v41, %v1959_v41 }
 0x17e   : > { %773 = vadd.xlane.f32.xlu2 %v746_v42 }
 0x181   : > { %v637_v47 = vpop.f32.mrf.mxu1 }
 0x182   : > { %v1964_v48 = vadd.f32 %v1889_v27, %v637_v47 }
 0x184   : > { %676 = vmatmul.bf16.gmra.mxu2 %v545_v49  ;;  %v747_v50 = vmul.f32 %v1964_v48, %v1964_v48 }
 0x186   : > { %775 = vadd.xlane.f32.xlu1 %v747_v50 }
 0x189   : > { %v639_v53 = vpop.f32.mrf.mxu1 }
 0x18a   : > { %v1971_v56 = vadd.f32 %v1889_v27, %v639_v53 }
 0x18c   : > { %v748_v58 = vmul.f32 %v1971_v56, %v1971_v56 }
 0x18e   : > { %777 = vadd.xlane.f32.xlu0 %v748_v58 }
 0x191   : > { %v642_v61 = vpop.f32.mrf.mxu1 }
 0x192   : > { %v1976_v62 = vadd.f32 %v1889_v27, %v642_v61 }
 0x194   : > { %681 = vmatmul.bf16.gmra.mxu2 %v546_v0  ;;  %v749_v1 = vmul.f32 %v1976_v62, %v1976_v62 }
 0x196   : > { %779 = vadd.xlane.f32.xlu2 %v749_v1 }
 0x199   : > { %v752_v58 = vpop.xlane.xlu1 %751 }
 0x1a7   : > { %v647_v22 = vpop.f32.mrf.mxu2 }
 0x1a8   : > { %v648_v2 = vadd.f32 %v1889_v27, %v647_v22 }
 0x1a9   : > { %v756_v46 = vpop.xlane.xlu0 %755 }
 0x1aa   : > { %v783_v3 = vmul.f32 %v648_v2, %v648_v2  ;;  %v687_v4 = vmul.f32 %v648_v2, %v1892_v31 }
 0x1ac   : > { %799 = vadd.xlane.f32.xlu2 %v783_v3  ;;  %703 = vadd.xlane.f32.xlu0 %v687_v4 }
 0x1af   : > { %v649_v6 = vpop.f32.mrf.mxu2 }
 0x1b0   : > { %v650_v7 = vadd.f32 %v1889_v27, %v649_v6  ;;  %v831_v6 = vmax.f32 %v752_v58, 1e-16 }
 0x1b1   : > { %v758_v22 = vpop.xlane.xlu1 %757 }
 0x1b2   : > { %v688_v8 = vmul.f32 %v650_v7, %v1899_v38  ;;  %v784_v13 = vmul.f32 %v650_v7, %v650_v7  ;;  %1591 = vrsqrt.f32 %v831_v6  ;;  %vm853_vm4 = vweird.f32 %v831_v6 }
 0x1b4   : > { %705 = vadd.xlane.f32.xlu0 %v688_v8 }
 0x1b7   : > { %v652_v9 = vpop.f32.mrf.mxu2 }
 0x1b8   : > { %v653_v10 = vadd.f32 %v1889_v27, %v652_v9 }
 0x1b9   : > { %v2004_v52 = vpop.xlane.xlu0 %759 }
 0x1ba   : > { %v689_v11 = vmul.f32 %v653_v10, %v1904_v44  ;;  %v785_v16 = vmul.f32 %v653_v10, %v653_v10  ;;  %v2061_v58 = vmax.f32 %v2004_v52, 1e-16 }
 0x1bc   : > { %707 = vadd.xlane.f32.xlu1 %v689_v11  ;;  %801 = vadd.xlane.f32.xlu0 %v784_v13  ;;  %v644_v13 = vpop.f32.mrf.mxu1 }
 0x1bf   : > { %v654_v14 = vpop.f32.mrf.mxu2 }
 0x1c0   : > { %v655_v15 = vadd.f32 %v1889_v27, %v654_v14 }
 0x1c2   : > { %v786_v31 = vmul.f32 %v655_v15, %v655_v15  ;;  %v690_v20 = vmul.f32 %v655_v15, %v1911_v51 }
 0x1c4   : > { %805 = vadd.xlane.f32.xlu2 %v786_v31  ;;  %803 = vadd.xlane.f32.xlu1 %v785_v16  ;;  %v1592_v31 = vpop.eup %1591 }
 0x1c5   : > { %vm854_vm2 = vweird.f32 %v1592_v31 }
 0x1c6   : > { %vm855_vm6 = vmor %vm853_vm4, %vm854_vm2 }
 0x1c7   : > { %v657_v17 = vpop.f32.mrf.mxu2 }
 0x1c8   : > { %v658_v19 = vadd.f32 %v1889_v27, %v657_v17  ;;  %v848_v17 = vmul.f32 %v1592_v31, %v831_v6 }
 0x1c9   : > { %v2020_v8 = vpop.xlane.xlu1 %763 }
 0x1ca   : > { %v691_v38 = vmul.f32 %v658_v19, %v1916_v57  ;;  %v787_v24 = vmul.f32 %v658_v19, %v658_v19 }
 0x1cc   : > { %711 = vadd.xlane.f32.xlu2 %v691_v38  ;;  %709 = vadd.xlane.f32.xlu1 %v690_v20 }
 0x1cf   : > { %v659_v44 = vpop.f32.mrf.mxu2 }
 0x1d0   : > { %v660_v21 = vadd.f32 %v1889_v27, %v659_v44 }
 0x1d2   : > { %v692_v23 = vmul.f32 %v660_v21, %v1923_v63  ;;  %v788_v25 = vmul.f32 %v660_v21, %v660_v21 }
 0x1d4   : > { %713 = vadd.xlane.f32.xlu2 %v692_v23  ;;  %807 = vadd.xlane.f32.xlu1 %v787_v24 }
 0x1d5   : > { %809 = vadd.xlane.f32.xlu0 %v788_v25 }
 0x1d7   : > { %v662_v28 = vpop.f32.mrf.mxu2 }
 0x1d8   : > { %v663_v29 = vadd.f32 %v1889_v27, %v662_v28  ;;  %v849_v28 = vmul.f32 %v1592_v31, %v848_v17 }
 0x1da   : > { %v789_v30 = vmul.f32 %v663_v29, %v663_v29  ;;  %v693_v57 = vmul.f32 %v663_v29, %v1928_v5  ;;  %v2034_v29 = vmax.f32 %v758_v22, 1e-16 }
 0x1dc   : > { %811 = vadd.xlane.f32.xlu2 %v789_v30  ;;  %v850_v30 = vmul.f32 0.5, %v849_v28  ;;  %vm883_vm0 = vweird.f32 %v2034_v29 }
 0x1dd   : > { %715 = vadd.xlane.f32.xlu0 %v693_v57  ;;  %v2037_v57 = vmax.f32 %v756_v46, 1e-16 }
 0x1df   : > { %v664_v51 = vpop.f32.mrf.mxu2  ;;  %vm873_vm10 = vweird.f32 %v2037_v57 }
 0x1e0   : > { %v665_v32 = vadd.f32 %v1889_v27, %v664_v51 }
 0x1e1   : > { %v2029_v16 = vpop.xlane.xlu1 %769 }
 0x1e2   : > { %v694_v34 = vmul.f32 %v665_v32, %v1935_v12  ;;  %v790_v37 = vmul.f32 %v665_v32, %v665_v32  ;;  %v754_v12 = vpop.xlane.xlu2 %753 }
 0x1e3   : > { %v2032_v24 = vmax.f32 %v754_v12, 1e-16 }
 0x1e4   : > { %717 = vadd.xlane.f32.xlu1 %v694_v34 }
 0x1e5   : > { %vm863_vm8 = vweird.f32 %v2032_v24 }
 0x1e7   : > { %v667_v63 = vpop.f32.mrf.mxu2 }
 0x1e8   : > { %v668_v35 = vadd.f32 %v1889_v27, %v667_v63  ;;  %v851_v63 = vsub.f32 1.5, %v850_v30  ;;  %v1263_v30 = vlaneseq }
 0x1ea   : > { %v695_v36 = vmul.f32 %v668_v35, %v1940_v18  ;;  %v791_v39 = vmul.f32 %v668_v35, %v668_v35  ;;  %v2002_v49 = vpop.xlane.xlu2 %761 }
 0x1ec   : > { %719 = vadd.xlane.f32.xlu2 %v695_v36  ;;  %813 = vadd.xlane.f32.xlu1 %v790_v37 }
 0x1ed   : > { %815 = vadd.xlane.f32.xlu0 %v791_v39 }
 0x1ef   : > { %v669_v40 = vpop.f32.mrf.mxu2 }
 0x1f0   : > { %v670_v5 = vadd.f32 %v1889_v27, %v669_v40 }
 0x1f2   : > { %v792_v42 = vmul.f32 %v670_v5, %v670_v5  ;;  %v696_v43 = vmul.f32 %v670_v5, %v1947_v26  ;;  %v2008_v59 = vpop.xlane.xlu2 %767 }
 0x1f4   : > { %817 = vadd.xlane.f32.xlu2 %v792_v42 }
 0x1f5   : > { %721 = vadd.xlane.f32.xlu0 %v696_v43  ;;  %v852_v43 = vmul.f32 %v1592_v31, %v851_v63 }
 0x1f7   : > { %v672_v45 = vpop.f32.mrf.mxu2 }
 0x1f8   : > { %v673_v47 = vadd.f32 %v1889_v27, %v672_v45 }
 0x1fa   : > { %v697_v18 = vmul.f32 %v673_v47, %v1952_v33  ;;  %v793_v26 = vmul.f32 %v673_v47, %v673_v47  ;;  %v2010_v33 = vpop.xlane.xlu0 %765 }
 0x1fc   : > { %723 = vadd.xlane.f32.xlu1 %v697_v18 }
 0x1ff   : > { %v674_v50 = vpop.f32.mrf.mxu2 }
 0x200   : > { %v675_v53 = vadd.f32 %v1889_v27, %v674_v50 }
 0x202   : > { %v698_v54 = vmul.f32 %v675_v53, %v1959_v41  ;;  %v794_v55 = vmul.f32 %v675_v53, %v675_v53  ;;  %v2014_v41 = vpop.xlane.xlu2 %773  ;;  %v2016_v3 = vpop.xlane.xlu0 %771 }
 0x204   : > { %725 = vadd.xlane.f32.xlu2 %v698_v54  ;;  %819 = vadd.xlane.f32.xlu1 %v793_v26  ;;  %v856_v54 = vsel %vm855_vm6, %v1592_v31, %v852_v43 }
 0x205   : > { %821 = vadd.xlane.f32.xlu0 %v794_v55 }
 0x207   : > { %v677_v60 = vpop.f32.mrf.mxu2 }
 0x208   : > { %v678_v61 = vadd.f32 %v1889_v27, %v677_v60 }
 0x20a   : > { %v795_v0 = vmul.f32 %v678_v61, %v678_v61  ;;  %v699_v1 = vmul.f32 %v678_v61, %v1964_v48  ;;  %v2022_v9 = vpop.xlane.xlu2 %779  ;;  %v2024_v10 = vpop.xlane.xlu0 %777 }
 0x20c   : > { %823 = vadd.xlane.f32.xlu2 %v795_v0 }
 0x20d   : > { %727 = vadd.xlane.f32.xlu0 %v699_v1 }
 0x20f   : > { %v679_v2 = vpop.f32.mrf.mxu2 }
 0x210   : > { %v680_v4 = vadd.f32 %v1889_v27, %v679_v2 }
 0x212   : > { %v700_v7 = vmul.f32 %v680_v4, %v1971_v56  ;;  %v796_v15 = vmul.f32 %v680_v4, %v680_v4  ;;  %v645_v56 = vadd.f32 %v1889_v27, %v644_v13 }
 0x214   : > { %729 = vadd.xlane.f32.xlu1 %v700_v7  ;;  %v750_v23 = vmul.f32 %v645_v56, %v645_v56 }
 0x217   : > { %v682_v48 = vpop.f32.mrf.mxu2 }
 0x218   : > { %v683_v11 = vadd.f32 %v1889_v27, %v682_v48 }
 0x21a   : > { %v701_v14 = vmul.f32 %v683_v11, %v1976_v62  ;;  %v797_v36 = vmul.f32 %v683_v11, %v683_v11  ;;  %v2071_v11 = vmax.f32 %v2002_v49, 1e-16 }
 0x21c   : > { %731 = vadd.xlane.f32.xlu2 %v701_v14  ;;  %825 = vadd.xlane.f32.xlu1 %v796_v15 }
 0x21f   : > { %v684_v19 = vpop.f32.mrf.mxu2  ;;  %v800_v38 = vpop.xlane.xlu2 %799 }
 0x220   : > { %v685_v20 = vadd.f32 %v1889_v27, %v684_v19  ;;  %v1007_v44 = vmax.f32 %v800_v38, 1e-16  ;;  %v704_v21 = vpop.xlane.xlu0 %703  ;;  %v2039_v27 = vpop.xlane.xlu1 %775 }
 0x222   : > { %1593 = vrsqrt.f32 %v1007_v44  ;;  %v798_v62 = vmul.f32 %v685_v20, %v685_v20  ;;  %v702_v25 = vmul.f32 %v685_v20, %v645_v56  ;;  %vm1029_vm5 = vweird.f32 %v1007_v44 }
 0x223   : > { %1595 = vrsqrt.f32 %v2032_v24 }
 0x224   : > { %829 = vadd.xlane.f32.xlu2 %v798_v62  ;;  %781 = vadd.xlane.f32.xlu1 %v750_v23  ;;  %1597 = vrsqrt.f32 %v2034_v29  ;;  %v2089_v23 = vmax.f32 %v2020_v8, 1e-16 }
 0x225   : > { %733 = vadd.xlane.f32.xlu0 %v702_v25  ;;  %1599 = vrsqrt.f32 %v2037_v57 }
 0x228   : > { %v1594_v51 = vpop.eup %1593  ;;  %v2041_v32 = vpop.xlane.xlu0 %705 }
 0x229   : > { %v1024_v34 = vmul.f32 %v1594_v51, %v1007_v44  ;;  %v2045_v37 = vpop.eup %1595  ;;  %vm1030_vm3 = vweird.f32 %v1594_v51 }
 0x22a   : > { %v2047_v40 = vpop.eup %1597  ;;  %v858_v5 = vmul.f32 %v2045_v37, %v2032_v24  ;;  %vm1031_vm7 = vmor %vm1029_vm5, %vm1030_vm3  ;;  %vm864_vm9 = vweird.f32 %v2045_v37 }
 0x22b   : > { %v1025_v35 = vmul.f32 %v1594_v51, %v1024_v34  ;;  %v2053_v46 = vpop.eup %1599  ;;  %v878_v50 = vmul.f32 %v2047_v40, %v2034_v29  ;;  %vm884_vm12 = vweird.f32 %v2047_v40  ;;  %vm2100_vm13 = vmor %vm863_vm8, %vm864_vm9 }
 0x22c   : > { %v859_v53 = vmul.f32 %v2045_v37, %v858_v5  ;;  %v868_v55 = vmul.f32 %v2053_v46, %v2037_v57  ;;  %vm874_vm15 = vweird.f32 %v2053_v46  ;;  %vm2123_vm2 = vmor %vm883_vm0, %vm884_vm12  ;;  %vm893_vm12 = vweird.f32 %v2061_v58 }
 0x22d   : > { %v1026_v39 = vmul.f32 0.5, %v1025_v35  ;;  %827 = vadd.xlane.f32.xlu0 %v797_v36  ;;  %v879_v61 = vmul.f32 %v2047_v40, %v878_v50  ;;  %vm2145_vm5 = vmor %vm873_vm10, %vm874_vm15  ;;  %vm1268_vm10 = vcmask 130112   ;;  %vm1276_vm15 = vcmask 261312  }
 0x22e   : > { %v860_v1 = vmul.f32 0.5, %v859_v53  ;;  %v869_v4 = vmul.f32 %v2053_v46, %v868_v55 }
 0x22f   : > { %v1027_v42 = vsub.f32 1.5, %v1026_v39  ;;  %v2051_v12 = vpop.xlane.xlu1 %707  ;;  %v880_v52 = vmul.f32 0.5, %v879_v61 }
 0x230   : > { %v802_v45 = vpop.xlane.xlu0 %801  ;;  %v861_v14 = vsub.f32 1.5, %v860_v1  ;;  %v870_v15 = vmul.f32 0.5, %v869_v4 }
 0x231   : > { %v1028_v47 = vmul.f32 %v1594_v51, %v1027_v42  ;;  %v1008_v18 = vmax.f32 %v802_v45, 1e-16  ;;  %v881_v17 = vsub.f32 1.5, %v880_v52 }
 0x232   : > { %v862_v38 = vmul.f32 %v2045_v37, %v861_v14 }
 0x233   : > { %v1032_v26 = vsel %vm1031_vm7, %v1594_v51, %v1028_v47  ;;  %1601 = vrsqrt.f32 %v1008_v18  ;;  %vm1039_vm14 = vweird.f32 %v1008_v18  ;;  %v882_v35 = vmul.f32 %v2047_v40, %v881_v17 }
 0x234   : > { %v1183_v60 = vmul.f32 %v1032_v26, %v856_v54  ;;  %1603 = vrsqrt.f32 %v2061_v58  ;;  %v866_v39 = vsel %vm2100_vm13, %v2045_v37, %v862_v38  ;;  %v2119_v47 = vand.u32 127, %v1263_v30 }
 0x235   : > { %v886_v26 = vsel %vm2123_vm2, %v2047_v40, %v882_v35  ;;  %v2177_v35 = vmax.f32 %v2010_v33, 1e-16  ;;  %vm903_vm13 = vweird.f32 %v2071_v11 }
 0x236   : > { %v1199_v0 = vmul.f32 %v1183_v60, %v704_v21  ;;  %v871_v21 = vsub.f32 1.5, %v870_v15  ;;  %v1266_v55 = vadd.s32 4294967288, %v2119_v47 }
 0x237   : > { %v806_v22 = vpop.xlane.xlu2 %805  ;;  %v804_v2 = vpop.xlane.xlu1 %803 }
 0x238   : > { %v2066_v6 = vmax.f32 %v806_v22, 1e-16  ;;  %v2068_v7 = vmax.f32 %v804_v2, 1e-16  ;;  %v1215_v5 = vadd.f32 1.0, %v1199_v0  ;;  %v872_v45 = vmul.f32 %v2053_v46, %v871_v21 }
 0x239   : > { %v1602_v48 = vpop.eup %1601 }
 0x23a   : > { %v1034_v13 = vmul.f32 %v1602_v48, %v1008_v18  ;;  %1605 = vrsqrt.f32 %v2066_v6  ;;  %v2076_v56 = vpop.eup %1603  ;;  %vm1040_vm11 = vweird.f32 %v1602_v48  ;;  %v1231_v22 = vmul.f32 0.5, %v1215_v5 }
 0x23b   : > { %1607 = vrsqrt.f32 %v2068_v7  ;;  %v888_v28 = vmul.f32 %v2076_v56, %v2061_v58  ;;  %vm1041_vm1 = vmor %vm1039_vm14, %vm1040_vm11  ;;  %vm1059_vm6 = vweird.f32 %v2066_v6  ;;  %vm1049_vm7 = vweird.f32 %v2068_v7 }
 0x23c   : > { %v1035_v31 = vmul.f32 %v1602_v48, %v1034_v13  ;;  %1609 = vrsqrt.f32 %v2071_v11  ;;  %vm894_vm11 = vweird.f32 %v2076_v56  ;;  %vm1272_vm14 = vcmask 195712  }
 0x23d   : > { %1611 = vrsqrt.f32 %v2089_v23  ;;  %v889_v50 = vmul.f32 %v2076_v56, %v888_v28  ;;  %vm2202_vm2 = vmor %vm893_vm12, %vm894_vm11 }
 0x23e   : > { %v1036_v19 = vmul.f32 0.5, %v1035_v31 }
 0x23f   : > { %v2081_v49 = vpop.xlane.xlu2 %711  ;;  %v2083_v20 = vpop.xlane.xlu1 %709  ;;  %v890_v15 = vmul.f32 0.5, %v889_v50 }
 0x240   : > { %v2085_v44 = vpop.eup %1605  ;;  %v1037_v62 = vsub.f32 1.5, %v1036_v19  ;;  %v876_v19 = vsel %vm2145_vm5, %v2053_v46, %v872_v45 }
 0x241   : > { %v2091_v25 = vpop.eup %1607  ;;  %v1054_v51 = vmul.f32 %v2085_v44, %v2066_v6  ;;  %vm1060_vm3 = vweird.f32 %v2085_v44 }
 0x242   : > { %v1038_v8 = vmul.f32 %v1602_v48, %v1037_v62  ;;  %v1044_v63 = vmul.f32 %v2091_v25, %v2068_v7  ;;  %v2107_v36 = vpop.eup %1609  ;;  %vm1050_vm4 = vweird.f32 %v2091_v25  ;;  %vm1061_vm8 = vmor %vm1059_vm6, %vm1060_vm3  ;;  %v1265_v62 = vperm.slane %v1231_v22, %v2119_v47 }
 0x243   : > { %v1055_v24 = vmul.f32 %v2085_v44, %v1054_v51  ;;  %v898_v53 = vmul.f32 %v2107_v36, %v2071_v11  ;;  %v2153_v14 = vpop.eup %1611  ;;  %vm1051_vm9 = vmor %vm1049_vm7, %vm1050_vm4  ;;  %v891_v51 = vsub.f32 1.5, %v890_v15  ;;  %vm904_vm0 = vweird.f32 %v2107_v36 }
 0x244   : > { %v1042_v42 = vsel %vm1041_vm1, %v1602_v48, %v1038_v8  ;;  %v1045_v43 = vmul.f32 %v2091_v25, %v1044_v63  ;;  %v908_v21 = vmul.f32 %v2153_v14, %v2089_v23  ;;  %v2207_v15 = vmax.f32 %v2029_v16, 1e-16  ;;  %vm2213_vm4 = vmor %vm903_vm13, %vm904_vm0 }
 0x245   : > { %v1184_v18 = vmul.f32 %v1042_v42, %v866_v39  ;;  %v1056_v37 = vmul.f32 0.5, %v1055_v24  ;;  %v899_v57 = vmul.f32 %v2107_v36, %v898_v53  ;;  %v1274_v39 = vadd.s32 4294967272, %v2119_v47 }
 0x246   : > { %v1046_v54 = vmul.f32 0.5, %v1045_v43  ;;  %v1270_v43 = vadd.s32 4294967280, %v2119_v47  ;;  %vm1284_vm0 = vcmask 392512  }
 0x247   : > { %v1200_v60 = vmul.f32 %v1184_v18, %v2041_v32  ;;  %v1057_v61 = vsub.f32 1.5, %v1056_v37  ;;  %v2136_v0 = vpop.xlane.xlu2 %713  ;;  %v808_v1 = vpop.xlane.xlu1 %807  ;;  %v900_v34 = vmul.f32 0.5, %v899_v57 }
 0x248   : > { %v1047_v2 = vsub.f32 1.5, %v1046_v54  ;;  %v2139_v4 = vmax.f32 %v808_v1, 1e-16  ;;  %v810_v48 = vpop.xlane.xlu0 %809  ;;  %v892_v54 = vmul.f32 %v2076_v56, %v891_v51 }
 0x249   : > { %v1216_v32 = vadd.f32 1.0, %v1200_v60  ;;  %v1058_v52 = vmul.f32 %v2085_v44, %v1057_v61  ;;  %v2151_v13 = vmax.f32 %v810_v48, 1e-16  ;;  %v901_v29 = vsub.f32 1.5, %v900_v34 }
 0x24a   : > { %v1048_v31 = vmul.f32 %v2091_v25, %v1047_v2  ;;  %1613 = vrsqrt.f32 %v2139_v4  ;;  %vm1069_vm5 = vweird.f32 %v2139_v4  ;;  %v896_v11 = vsel %vm2202_vm2, %v2076_v56, %v892_v54 }
 0x24b   : > { %v1232_v17 = vmul.f32 0.5, %v1216_v32  ;;  %v1062_v6 = vsel %vm1061_vm8, %v2085_v44, %v1058_v52  ;;  %1615 = vrsqrt.f32 %v2151_v13  ;;  %v902_v22 = vmul.f32 %v2107_v36, %v901_v29 }
 0x24c   : > { %v1052_v7 = vsel %vm1051_vm9, %v2091_v25, %v1048_v31  ;;  %v1186_v38 = vmul.f32 %v1062_v6, %v886_v26  ;;  %vm1079_vm7 = vweird.f32 %v2151_v13  ;;  %vm913_vm9 = vweird.f32 %v2089_v23 }
 0x24d   : > { %v1267_v28 = vperm.slane %v1232_v17, %v1266_v55  ;;  %v1185_v30 = vmul.f32 %v1052_v7, %v876_v19 }
 0x24e   : > { %v1202_v44 = vmul.f32 %v1186_v38, %v2083_v20  ;;  %v909_v20 = vmul.f32 %v2153_v14, %v908_v21 }
 0x24f   : > { %v1201_v46 = vmul.f32 %v1185_v30, %v2051_v12  ;;  %v1269_v25 = vsel %vm1268_vm10, %v1267_v28, %v1265_v62  ;;  %v812_v8 = vpop.xlane.xlu2 %811  ;;  %v2186_v12 = vmax.f32 %v2008_v59, 1e-16  ;;  %vm914_vm10 = vweird.f32 %v2153_v14 }
 0x250   : > { %v1614_v63 = vpop.eup %1613  ;;  %v1218_v24 = vadd.f32 1.0, %v1202_v44  ;;  %v2180_v5 = vmax.f32 %v812_v8, 1e-16  ;;  %v910_v61 = vmul.f32 0.5, %v909_v20  ;;  %v716_v17 = vpop.xlane.xlu0 %715  ;;  %v1282_v20 = vadd.s32 4294967256, %v2119_v47  ;;  %vm915_vm13 = vmor %vm913_vm9, %vm914_vm10 }
 0x251   : > { %v1616_v42 = vpop.eup %1615  ;;  %v1217_v45 = vadd.f32 1.0, %v1201_v46  ;;  %v1064_v18 = vmul.f32 %v1614_v63, %v2139_v4  ;;  %vm1070_vm1 = vweird.f32 %v1614_v63  ;;  %v906_v4 = vsel %vm2213_vm4, %v2107_v36, %v902_v22 }
 0x252   : > { %v1234_v37 = vmul.f32 0.5, %v1218_v24  ;;  %v1074_v33 = vmul.f32 %v1616_v42, %v2151_v13  ;;  %1617 = vrsqrt.f32 %v2180_v5  ;;  %vm1080_vm3 = vweird.f32 %v1616_v42  ;;  %vm1071_vm6 = vmor %vm1069_vm5, %vm1070_vm1 }
 0x253   : > { %v1233_v50 = vmul.f32 0.5, %v1217_v45  ;;  %v1065_v53 = vmul.f32 %v1614_v63, %v1064_v18  ;;  %1619 = vrsqrt.f32 %v2177_v35  ;;  %v911_v7 = vsub.f32 1.5, %v910_v61  ;;  %vm1081_vm8 = vmor %vm1079_vm7, %vm1080_vm3 }
 0x254   : > { %v1275_v26 = vperm.slane %v1234_v37, %v1274_v39  ;;  %v1075_v55 = vmul.f32 %v1616_v42, %v1074_v33  ;;  %1621 = vrsqrt.f32 %v2186_v12  ;;  %v1278_v24 = vadd.s32 4294967264, %v2119_v47 }
 0x255   : > { %v1271_v60 = vperm.slane %v1233_v50, %v1270_v43  ;;  %v1066_v59 = vmul.f32 0.5, %v1065_v53  ;;  %1623 = vrsqrt.f32 %v2207_v15  ;;  %v912_v46 = vmul.f32 %v2153_v14, %v911_v7 }
 0x256   : > { %v1076_v1 = vmul.f32 0.5, %v1075_v55  ;;  %vm1089_vm12 = vweird.f32 %v2180_v5  ;;  %vm1288_vm1 = vcmask 458112   ;;  %vm923_vm4 = vweird.f32 %v2177_v35 }
 0x257   : > { %v1273_v2 = vsel %vm1272_vm14, %v1271_v60, %v1269_v25  ;;  %v1067_v48 = vsub.f32 1.5, %v1066_v59  ;;  %v2196_v40 = vpop.xlane.xlu1 %717  ;;  %v916_v50 = vsel %vm915_vm13, %v2153_v14, %v912_v46  ;;  %vm933_vm7 = vweird.f32 %v2186_v12 }
 0x258   : > { %v1618_v32 = vpop.eup %1617  ;;  %v1277_v31 = vsel %vm1276_vm15, %v1275_v26, %v1273_v2  ;;  %v1077_v57 = vsub.f32 1.5, %v1076_v1  ;;  %vm1280_vm15 = vcmask 326912  }
 0x259   : > { %v1068_v58 = vmul.f32 %v1614_v63, %v1067_v48  ;;  %v1084_v19 = vmul.f32 %v1618_v32, %v2180_v5  ;;  %v2220_v38 = vpop.eup %1619  ;;  %vm1090_vm11 = vweird.f32 %v1618_v32 }
 0x25a   : > { %v1078_v16 = vmul.f32 %v1616_v42, %v1077_v57  ;;  %v2225_v28 = vpop.eup %1621  ;;  %v918_v56 = vmul.f32 %v2220_v38, %v2177_v35  ;;  %vm1091_vm14 = vmor %vm1089_vm12, %vm1090_vm11  ;;  %vm924_vm2 = vweird.f32 %v2220_v38 }
 0x25b   : > { %v1072_v21 = vsel %vm1071_vm6, %v1614_v63, %v1068_v58  ;;  %v1085_v62 = vmul.f32 %v1618_v32, %v1084_v19  ;;  %v928_v36 = vmul.f32 %v2225_v28, %v2186_v12  ;;  %v2251_v37 = vpop.eup %1623  ;;  %v2266_v19 = vmax.f32 %v2016_v3, 1e-16  ;;  %vm2284_vm6 = vmor %vm923_vm4, %vm924_vm2 }
 0x25c   : > { %v1187_v30 = vmul.f32 %v1072_v21, %v896_v11  ;;  %v1082_v44 = vsel %vm1081_vm8, %v1616_v42, %v1078_v16  ;;  %v919_v33 = vmul.f32 %v2220_v38, %v918_v56  ;;  %v938_v55 = vmul.f32 %v2251_v37, %v2207_v15 }
 0x25d   : > { %v1188_v13 = vmul.f32 %v1082_v44, %v906_v4  ;;  %v1086_v51 = vmul.f32 0.5, %v1085_v62  ;;  %v929_v23 = vmul.f32 %v2225_v28, %v928_v36  ;;  %vm934_vm3 = vweird.f32 %v2225_v28 }
 0x25e   : > { %v1203_v34 = vmul.f32 %v1187_v30, %v2081_v49  ;;  %v920_v61 = vmul.f32 0.5, %v919_v33  ;;  %v939_v58 = vmul.f32 %v2251_v37, %v938_v55  ;;  %vm2292_vm9 = vmor %vm933_vm7, %vm934_vm3  ;;  %vm1292_vm4 = vcmask 523712  }
 0x25f   : > { %v1204_v25 = vmul.f32 %v1188_v13, %v2136_v0  ;;  %v1087_v8 = vsub.f32 1.5, %v1086_v51  ;;  %v2240_v63 = vpop.xlane.xlu2 %719  ;;  %v814_v39 = vpop.xlane.xlu1 %813  ;;  %v930_v48 = vmul.f32 0.5, %v929_v23 }
 0x260   : > { %v1219_v42 = vadd.f32 1.0, %v1203_v34  ;;  %v2244_v49 = vmax.f32 %v814_v39, 1e-16  ;;  %v816_v43 = vpop.xlane.xlu0 %815  ;;  %v921_v11 = vsub.f32 1.5, %v920_v61 }
 0x261   : > { %v1220_v45 = vadd.f32 1.0, %v1204_v25  ;;  %v1088_v0 = vmul.f32 %v1618_v32, %v1087_v8  ;;  %v2249_v18 = vmax.f32 %v816_v43, 1e-16  ;;  %v931_v62 = vsub.f32 1.5, %v930_v48 }
 0x262   : > { %v1235_v29 = vmul.f32 0.5, %v1219_v42  ;;  %1625 = vrsqrt.f32 %v2244_v49  ;;  %v922_v51 = vmul.f32 %v2220_v38, %v921_v11  ;;  %vm1099_vm10 = vweird.f32 %v2244_v49 }
 0x263   : > { %v1236_v53 = vmul.f32 0.5, %v1220_v45  ;;  %v1092_v54 = vsel %vm1091_vm14, %v1618_v32, %v1088_v0  ;;  %1627 = vrsqrt.f32 %v2249_v18  ;;  %v1286_v32 = vadd.s32 4294967248, %v2119_v47 }
 0x264   : > { %v1279_v5 = vperm.slane %v1235_v29, %v1278_v24  ;;  %v1189_v26 = vmul.f32 %v1092_v54, %v916_v50  ;;  %v932_v25 = vmul.f32 %v2225_v28, %v931_v62  ;;  %v2299_v43 = vmax.f32 %v2039_v27, 1e-16 }
 0x265   : > { %v1283_v60 = vperm.slane %v1236_v53, %v1282_v20  ;;  %vm1109_vm12 = vweird.f32 %v2249_v18  ;;  %v926_v0 = vsel %vm2284_vm6, %v2220_v38, %v922_v51  ;;  %vm943_vm14 = vweird.f32 %v2207_v15 }
 0x266   : > { %v1281_v59 = vsel %vm1280_vm15, %v1279_v5, %v1277_v31  ;;  %v1205_v14 = vmul.f32 %v1189_v26, %v716_v17  ;;  %v2270_v31 = vmax.f32 %v2014_v41, 1e-16  ;;  %v940_v41 = vmul.f32 0.5, %v939_v58 }
 0x267   : > { %v1285_v1 = vsel %vm1284_vm0, %v1283_v60, %v1281_v59  ;;  %v818_v22 = vpop.xlane.xlu2 %817  ;;  %v936_v27 = vsel %vm2292_vm9, %v2225_v28, %v932_v25  ;;  %vm944_vm15 = vweird.f32 %v2251_v37  ;;  %v1298_v51 = vadd.s32 4294967224, %v2119_v47 }
 0x268   : > { %v1626_v2 = vpop.eup %1625  ;;  %v1221_v52 = vadd.f32 1.0, %v1205_v14  ;;  %v2262_v57 = vmax.f32 %v818_v22, 1e-16  ;;  %v722_v39 = vpop.xlane.xlu0 %721  ;;  %v941_v20 = vsub.f32 1.5, %v940_v41  ;;  %v1290_v14 = vadd.s32 4294967240, %v2119_v47  ;;  %vm945_vm2 = vmor %vm943_vm14, %vm944_vm15 }
 0x269   : > { %v1628_v6 = vpop.eup %1627  ;;  %v1094_v7 = vmul.f32 %v1626_v2, %v2244_v49  ;;  %vm1100_vm5 = vweird.f32 %v1626_v2  ;;  %v2351_v25 = vmax.f32 %v2024_v10, 1e-16  ;;  %vm1300_vm6 = vcmask 654912  }
 0x26a   : > { %v1237_v17 = vmul.f32 0.5, %v1221_v52  ;;  %v1104_v16 = vmul.f32 %v1628_v6, %v2249_v18  ;;  %1629 = vrsqrt.f32 %v2262_v57  ;;  %vm1110_vm8 = vweird.f32 %v1628_v6  ;;  %vm1101_vm11 = vmor %vm1099_vm10, %vm1100_vm5 }
 0x26b   : > { %v1095_v21 = vmul.f32 %v1626_v2, %v1094_v7  ;;  %1631 = vrsqrt.f32 %v2266_v19  ;;  %vm1111_vm13 = vmor %vm1109_vm12, %vm1110_vm8  ;;  %v942_v5 = vmul.f32 %v2251_v37, %v941_v20  ;;  %vm1296_vm5 = vcmask 589312  }
 0x26c   : > { %v1287_v4 = vperm.slane %v1237_v17, %v1286_v32  ;;  %v1105_v30 = vmul.f32 %v1628_v6, %v1104_v16  ;;  %1633 = vrsqrt.f32 %v2270_v31  ;;  %vm953_vm8 = vweird.f32 %v2266_v19 }
 0x26d   : > { %v1096_v3 = vmul.f32 0.5, %v1095_v21  ;;  %1635 = vrsqrt.f32 %v2299_v43  ;;  %vm963_vm12 = vweird.f32 %v2270_v31 }
 0x26e   : > { %v2278_v44 = vsel %vm1288_vm1, %v1287_v4, %v1285_v1  ;;  %v1106_v13 = vmul.f32 0.5, %v1105_v30  ;;  %v1294_v1 = vadd.s32 4294967232, %v2119_v47  ;;  %vm1119_vm1 = vweird.f32 %v2262_v57 }
 0x26f   : > { %v1097_v56 = vsub.f32 1.5, %v1096_v3  ;;  %v2282_v34 = vpop.xlane.xlu1 %723 }
 0x270   : > { %v1630_v46 = vpop.eup %1629  ;;  %v1107_v8 = vsub.f32 1.5, %v1106_v13 }
 0x271   : > { %v1098_v24 = vmul.f32 %v1626_v2, %v1097_v56  ;;  %v1114_v42 = vmul.f32 %v1630_v46, %v2262_v57  ;;  %v2303_v45 = vpop.eup %1631  ;;  %vm1120_vm0 = vweird.f32 %v1630_v46 }
 0x272   : > { %v1108_v12 = vmul.f32 %v1628_v6, %v1107_v8  ;;  %v2308_v29 = vpop.eup %1633  ;;  %v948_v38 = vmul.f32 %v2303_v45, %v2266_v19  ;;  %vm1121_vm3 = vmor %vm1119_vm1, %vm1120_vm0  ;;  %vm954_vm7 = vweird.f32 %v2303_v45 }
 0x273   : > { %v1102_v33 = vsel %vm1101_vm11, %v1626_v2, %v1098_v24  ;;  %v1115_v49 = vmul.f32 %v1630_v46, %v1114_v42  ;;  %v958_v28 = vmul.f32 %v2308_v29, %v2270_v31  ;;  %v2341_v57 = vpop.eup %1635  ;;  %vm964_vm9 = vweird.f32 %v2308_v29  ;;  %vm2366_vm11 = vmor %vm953_vm8, %vm954_vm7 }
 0x274   : > { %v1190_v50 = vmul.f32 %v1102_v33, %v926_v0  ;;  %v1112_v53 = vsel %vm1111_vm13, %v1628_v6, %v1108_v12  ;;  %v949_v32 = vmul.f32 %v2303_v45, %v948_v38  ;;  %v946_v6 = vsel %vm945_vm2, %v2251_v37, %v942_v5  ;;  %vm2372_vm14 = vmor %vm963_vm12, %vm964_vm9 }
 0x275   : > { %v1191_v18 = vmul.f32 %v1112_v53, %v936_v27  ;;  %v1116_v54 = vmul.f32 0.5, %v1115_v49  ;;  %v959_v15 = vmul.f32 %v2308_v29, %v958_v28  ;;  %v968_v4 = vmul.f32 %v2341_v57, %v2299_v43 }
 0x276   : > { %v1206_v23 = vmul.f32 %v1190_v50, %v2196_v40  ;;  %v950_v62 = vmul.f32 0.5, %v949_v32  ;;  %vm1304_vm9 = vcmask 720512  }
 0x277   : > { %v1207_v26 = vmul.f32 %v1191_v18, %v2240_v63  ;;  %v1117_v55 = vsub.f32 1.5, %v1116_v54  ;;  %v2323_v60 = vpop.xlane.xlu2 %725  ;;  %v820_v59 = vpop.xlane.xlu1 %819  ;;  %v960_v13 = vmul.f32 0.5, %v959_v15  ;;  %v969_v24 = vmul.f32 %v2341_v57, %v968_v4 }
 0x278   : > { %v1222_v61 = vadd.f32 1.0, %v1206_v23  ;;  %v2327_v22 = vmax.f32 %v820_v59, 1e-16  ;;  %v822_v40 = vpop.xlane.xlu0 %821  ;;  %v951_v35 = vsub.f32 1.5, %v950_v62  ;;  %v1302_v15 = vadd.s32 4294967216, %v2119_v47 }
 0x279   : > { %v1223_v2 = vadd.f32 1.0, %v1207_v26  ;;  %v1118_v63 = vmul.f32 %v1630_v46, %v1117_v55  ;;  %v2334_v48 = vmax.f32 %v822_v40, 1e-16  ;;  %v961_v20 = vsub.f32 1.5, %v960_v13 }
 0x27a   : > { %v1238_v52 = vmul.f32 0.5, %v1222_v61  ;;  %1637 = vrsqrt.f32 %v2327_v22  ;;  %v952_v27 = vmul.f32 %v2303_v45, %v951_v35  ;;  %v970_v50 = vmul.f32 0.5, %v969_v24 }
 0x27b   : > { %v1239_v58 = vmul.f32 0.5, %v1223_v2  ;;  %v1122_v7 = vsel %vm1121_vm3, %v1630_v46, %v1118_v63  ;;  %1639 = vrsqrt.f32 %v2334_v48  ;;  %v962_v23 = vmul.f32 %v2308_v29, %v961_v20 }
 0x27c   : > { %v1291_v17 = vperm.slane %v1238_v52, %v1290_v14  ;;  %v1192_v16 = vmul.f32 %v1122_v7, %v946_v6  ;;  %vm1129_vm15 = vweird.f32 %v2327_v22  ;;  %vm1139_vm1 = vweird.f32 %v2334_v48 }
 0x27d   : > { %v1295_v11 = vperm.slane %v1239_v58, %v1294_v1  ;;  %v956_v31 = vsel %vm2366_vm11, %v2303_v45, %v952_v27  ;;  %v971_v14 = vsub.f32 1.5, %v970_v50  ;;  %vm974_vm3 = vweird.f32 %v2341_v57 }
 0x27e   : > { %v1293_v21 = vsel %vm1292_vm4, %v1291_v17, %v2278_v44  ;;  %v1208_v37 = vmul.f32 %v1192_v16, %v722_v39  ;;  %v2403_v62 = vmax.f32 %v2022_v9, 1e-16  ;;  %v1310_v35 = vadd.s32 4294967200, %v2119_v47 }
 0x27f   : > { %v1297_v30 = vsel %vm1296_vm5, %v1295_v11, %v1293_v21  ;;  %v824_v3 = vpop.xlane.xlu2 %823  ;;  %v972_v58 = vmul.f32 %v2341_v57, %v971_v14  ;;  %vm973_vm5 = vweird.f32 %v2299_v43  ;;  %vm1312_vm11 = vcmask 851712  }
 0x280   : > { %v1638_v41 = vpop.eup %1637  ;;  %v1224_v56 = vadd.f32 1.0, %v1208_v37  ;;  %v2348_v46 = vmax.f32 %v824_v3, 1e-16  ;;  %v728_v16 = vpop.xlane.xlu0 %727  ;;  %vm975_vm7 = vmor %vm973_vm5, %vm974_vm3 }
 0x281   : > { %v1640_v36 = vpop.eup %1639  ;;  %v1124_v44 = vmul.f32 %v1638_v41, %v2327_v22  ;;  %vm1130_vm10 = vweird.f32 %v1638_v41  ;;  %v966_v22 = vsel %vm2372_vm14, %v2308_v29, %v962_v23  ;;  %vm983_vm14 = vweird.f32 %v2351_v25 }
 0x282   : > { %v1240_v8 = vmul.f32 0.5, %v1224_v56  ;;  %v1134_v39 = vmul.f32 %v1640_v36, %v2334_v48  ;;  %1641 = vrsqrt.f32 %v2348_v46  ;;  %vm1140_vm13 = vweird.f32 %v1640_v36  ;;  %vm1131_vm0 = vmor %vm1129_vm15, %vm1130_vm10 }
 0x283   : > { %v1125_v42 = vmul.f32 %v1638_v41, %v1124_v44  ;;  %1643 = vrsqrt.f32 %v2351_v25  ;;  %vm1141_vm2 = vmor %vm1139_vm1, %vm1140_vm13  ;;  %vm1308_vm10 = vcmask 786112  }
 0x284   : > { %v1299_v12 = vperm.slane %v1240_v8, %v1298_v51  ;;  %v1135_v0 = vmul.f32 %v1640_v36, %v1134_v39 }
 0x285   : > { %v1126_v10 = vmul.f32 0.5, %v1125_v42 }
 0x286   : > { %v2361_v33 = vsel %vm1300_vm6, %v1299_v12, %v1297_v30  ;;  %v1136_v49 = vmul.f32 0.5, %v1135_v0  ;;  %vm1149_vm6 = vweird.f32 %v2348_v46  ;;  %v976_v30 = vsel %vm975_vm7, %v2341_v57, %v972_v58 }
 0x287   : > { %v1127_v53 = vsub.f32 1.5, %v1126_v10  ;;  %v2364_v18 = vpop.xlane.xlu1 %729 }
 0x288   : > { %v1642_v54 = vpop.eup %1641  ;;  %v1137_v19 = vsub.f32 1.5, %v1136_v49 }
 0x289   : > { %v1128_v28 = vmul.f32 %v1638_v41, %v1127_v53  ;;  %v1144_v26 = vmul.f32 %v1642_v54, %v2348_v46  ;;  %v2379_v59 = vpop.eup %1643  ;;  %vm1150_vm4 = vweird.f32 %v1642_v54 }
 0x28a   : > { %v1138_v55 = vmul.f32 %v1640_v36, %v1137_v19  ;;  %v978_v48 = vmul.f32 %v2379_v59, %v2351_v25  ;;  %vm1151_vm8 = vmor %vm1149_vm6, %vm1150_vm4  ;;  %vm984_vm12 = vweird.f32 %v2379_v59 }
 0x28b   : > { %v1132_v61 = vsel %vm1131_vm0, %v1638_v41, %v1128_v28  ;;  %v1145_v1 = vmul.f32 %v1642_v54, %v1144_v26  ;;  %vm985_vm15 = vmor %vm983_vm14, %vm984_vm12 }
 0x28c   : > { %v1193_v40 = vmul.f32 %v1132_v61, %v956_v31  ;;  %v1142_v2 = vsel %vm1141_vm2, %v1640_v36, %v1138_v55  ;;  %v979_v37 = vmul.f32 %v2379_v59, %v978_v48 }
 0x28d   : > { %v1194_v63 = vmul.f32 %v1142_v2, %v966_v22  ;;  %v1146_v32 = vmul.f32 0.5, %v1145_v1 }
 0x28e   : > { %v1209_v52 = vmul.f32 %v1193_v40, %v2282_v34  ;;  %v1306_v34 = vadd.s32 4294967208, %v2119_v47  ;;  %v980_v56 = vmul.f32 0.5, %v979_v37 }
 0x28f   : > { %v1210_v45 = vmul.f32 %v1194_v63, %v2323_v60  ;;  %v1147_v6 = vsub.f32 1.5, %v1146_v32  ;;  %v2393_v7 = vpop.xlane.xlu2 %731  ;;  %v826_v29 = vpop.xlane.xlu1 %825 }
 0x290   : > { %v1225_v17 = vadd.f32 1.0, %v1209_v52  ;;  %v1020_v11 = vmax.f32 %v826_v29, 1e-16  ;;  %v981_v0 = vsub.f32 1.5, %v980_v56 }
 0x291   : > { %v1226_v21 = vadd.f32 1.0, %v1210_v45  ;;  %v1148_v60 = vmul.f32 %v1642_v54, %v1147_v6 }
 0x292   : > { %v1241_v43 = vmul.f32 0.5, %v1225_v17  ;;  %1645 = vrsqrt.f32 %v1020_v11  ;;  %v982_v53 = vmul.f32 %v2379_v59, %v981_v0  ;;  %vm1159_vm0 = vweird.f32 %v1020_v11 }
 0x293   : > { %v1242_v4 = vmul.f32 0.5, %v1226_v21  ;;  %v1152_v3 = vsel %vm1151_vm8, %v1642_v54, %v1148_v60  ;;  %1647 = vrsqrt.f32 %v2403_v62  ;;  %vm1316_vm8 = vcmask 917312  }
 0x294   : > { %v1303_v41 = vperm.slane %v1241_v43, %v1302_v15  ;;  %v1195_v13 = vmul.f32 %v1152_v3, %v976_v30  ;;  %v986_v14 = vsel %vm985_vm15, %v2379_v59, %v982_v53  ;;  %v1314_v59 = vadd.s32 4294967192, %v2119_v47 }
 0x295   : > { %v1307_v51 = vperm.slane %v1242_v4, %v1306_v34  ;;  %vm1320_vm15 = vcmask 982912  }
 0x296   : > { %v1305_v46 = vsel %vm1304_vm9, %v1303_v41, %v2361_v33  ;;  %v1211_v9 = vmul.f32 %v1195_v13, %v728_v16 }
 0x297   : > { %v1309_v36 = vsel %vm1308_vm10, %v1307_v51, %v1305_v46  ;;  %v830_v44 = vpop.xlane.xlu2 %829  ;;  %v782_v8 = vpop.xlane.xlu1 %781 }
 0x298   : > { %v1646_v39 = vpop.eup %1645  ;;  %v1227_v24 = vadd.f32 1.0, %v1211_v9  ;;  %v1022_v57 = vmax.f32 %v830_v44, 1e-16  ;;  %v846_v42 = vmax.f32 %v782_v8, 1e-16  ;;  %v2410_v20 = vpop.xlane.xlu0 %733 }
 0x299   : > { %v1154_v12 = vmul.f32 %v1646_v39, %v1020_v11  ;;  %v2412_v33 = vpop.eup %1647  ;;  %vm1160_vm13 = vweird.f32 %v1646_v39 }
 0x29a   : > { %v1243_v10 = vmul.f32 0.5, %v1227_v24  ;;  %1649 = vrsqrt.f32 %v1022_v57  ;;  %v988_v38 = vmul.f32 %v2412_v33, %v2403_v62  ;;  %vm1161_vm1 = vmor %vm1159_vm0, %vm1160_vm13  ;;  %vm1179_vm4 = vweird.f32 %v1022_v57 }
 0x29b   : > { %v1155_v49 = vmul.f32 %v1646_v39, %v1154_v12  ;;  %1651 = vrsqrt.f32 %v846_v42  ;;  %vm1003_vm6 = vweird.f32 %v846_v42  ;;  %vm994_vm9 = vweird.f32 %v2412_v33 }
 0x29c   : > { %v1311_v27 = vperm.slane %v1243_v10, %v1310_v35  ;;  %v989_v1 = vmul.f32 %v2412_v33, %v988_v38  ;;  %vm1324_vm0 = vcmask 1048512  }
 0x29d   : > { %v1156_v50 = vmul.f32 0.5, %v1155_v49 }
 0x29e   : > { %v1313_v54 = vsel %vm1312_vm11, %v1311_v27, %v1309_v36  ;;  %v990_v52 = vmul.f32 0.5, %v989_v1  ;;  %vm993_vm11 = vweird.f32 %v2403_v62  ;;  %v1322_v62 = vadd.s32 4294967176, %v2119_v47 }
 0x29f   : > { %v1157_v23 = vsub.f32 1.5, %v1156_v50  ;;  %vm995_vm12 = vmor %vm993_vm11, %vm994_vm9 }
 0x2a0   : > { %v1650_v19 = vpop.eup %1649  ;;  %v828_v5 = vpop.xlane.xlu0 %827 }
 0x2a1   : > { %v1652_v28 = vpop.eup %1651  ;;  %v1158_v26 = vmul.f32 %v1646_v39, %v1157_v23  ;;  %v1174_v55 = vmul.f32 %v1650_v19, %v1022_v57  ;;  %v1021_v31 = vmax.f32 %v828_v5, 1e-16  ;;  %vm1180_vm2 = vweird.f32 %v1650_v19 }
 0x2a2   : > { %v998_v61 = vmul.f32 %v1652_v28, %v846_v42  ;;  %vm1004_vm3 = vweird.f32 %v1652_v28  ;;  %vm1181_vm5 = vmor %vm1179_vm4, %vm1180_vm2 }
 0x2a3   : > { %v1162_v22 = vsel %vm1161_vm1, %v1646_v39, %v1158_v26  ;;  %v1175_v40 = vmul.f32 %v1650_v19, %v1174_v55  ;;  %1653 = vrsqrt.f32 %v1021_v31  ;;  %vm1005_vm7 = vmor %vm1003_vm6, %vm1004_vm3  ;;  %vm1169_vm13 = vweird.f32 %v1021_v31 }
 0x2a4   : > { %v1196_v2 = vmul.f32 %v1162_v22, %v986_v14  ;;  %v999_v63 = vmul.f32 %v1652_v28, %v998_v61  ;;  %v1318_v39 = vadd.s32 4294967184, %v2119_v47 }
 0x2a5   : > { %v1176_v32 = vmul.f32 0.5, %v1175_v40 }
 0x2a6   : > { %v1212_v25 = vmul.f32 %v1196_v2, %v2364_v18  ;;  %v1000_v48 = vmul.f32 0.5, %v999_v63  ;;  %v991_v18 = vsub.f32 1.5, %v990_v52 }
 0x2a7   : > { %v1177_v45 = vsub.f32 1.5, %v1176_v32 }
 0x2a8   : > { %v1228_v6 = vadd.f32 1.0, %v1212_v25  ;;  %v1001_v58 = vsub.f32 1.5, %v1000_v48  ;;  %v992_v3 = vmul.f32 %v2412_v33, %v991_v18 }
 0x2a9   : > { %v1654_v29 = vpop.eup %1653  ;;  %v1178_v15 = vmul.f32 %v1650_v19, %v1177_v45 }
 0x2aa   : > { %v1244_v17 = vmul.f32 0.5, %v1228_v6  ;;  %v1002_v16 = vmul.f32 %v1652_v28, %v1001_v58  ;;  %v1164_v11 = vmul.f32 %v1654_v29, %v1021_v31  ;;  %vm1170_vm10 = vweird.f32 %v1654_v29 }
 0x2ab   : > { %v1182_v34 = vsel %vm1181_vm5, %v1650_v19, %v1178_v15  ;;  %vm1171_vm14 = vmor %vm1169_vm13, %vm1170_vm10  ;;  %v996_v56 = vsel %vm995_vm12, %v2412_v33, %v992_v3 }
 0x2ac   : > { %v1006_v21 = vsel %vm1005_vm7, %v1652_v28, %v1002_v16  ;;  %v1165_v60 = vmul.f32 %v1654_v29, %v1164_v11  ;;  %v1315_v37 = vperm.slane %v1244_v17, %v1314_v59 }
 0x2ad   : > { %v1198_v43 = vmul.f32 %v1182_v34, %v1006_v21 }
 0x2ae   : > { %v1166_v4 = vmul.f32 0.5, %v1165_v60  ;;  %v1317_v30 = vsel %vm1316_vm8, %v1315_v37, %v1313_v54 }
 0x2af   : > { %v1214_v13 = vmul.f32 %v1198_v43, %v2410_v20 }
 0x2b0   : > { %v1167_v41 = vsub.f32 1.5, %v1166_v4 }
 0x2b1   : > { %v1230_v36 = vadd.f32 1.0, %v1214_v13 }
 0x2b2   : > { %v1168_v51 = vmul.f32 %v1654_v29, %v1167_v41 }
 0x2b3   : > { %v1246_v35 = vmul.f32 0.5, %v1230_v36 }
 0x2b4   : > { %v1172_v46 = vsel %vm1171_vm14, %v1654_v29, %v1168_v51 }
 0x2b5   : > { %v1197_v9 = vmul.f32 %v1172_v46, %v996_v56  ;;  %v1323_v42 = vperm.slane %v1246_v35, %v1322_v62 }
 0x2b7   : > { %v1213_v44 = vmul.f32 %v1197_v9, %v2393_v7 }
 0x2b9   : > { %v1229_v8 = vadd.f32 1.0, %v1213_v44 }
 0x2bb   : > { %v1245_v24 = vmul.f32 0.5, %v1229_v8 }
 0x2bd   : > { %v1319_v57 = vperm.slane %v1245_v24, %v1318_v39 }
 0x2bf   : > { %v1321_v7 = vsel %vm1320_vm15, %v1319_v57, %v1317_v30 }
 0x2c0   : > { %v1325_v20 = vsel %vm1324_vm0, %v1323_v42, %v1321_v7 }
 0x2c1   : > { %1327 = vst [vmem:[%s216_s26] sm:$0x1] %v1325_v20 }
 0x2c2   : > { %1682 = shalt.err (!%p1679_p3)
}
 0x2c3   : > { %1550 = dma.vmem_to_hbm [thread:$0]  (%p1787_p5), %s1340_s30, 16, %s1342_s6, %s1329_s7  }
 0x2c4 PF: > { %p1556_p4 = scmp.ge.s32.totalorder %s1717_s21, 2  ;;  %s1353_s11 = sand.u32 1, %s1705_s18  }
 0x2c5   : > { %s1354_s15 = scalar_lea.sflag [#allocation3], %s1353_s11 }
 0x2c6   : > { %p1553_p7 = pnand %p1556_p4, %p1791_p6 }
 0x2c8   : > { %p1554_p8 = pneg %p1553_p7 }
 0x2ca   : > { %1700 = dma.done.wait (%p1554_p8), %s1354_s15, 16  }
 0x2cb   : > { %1702 = vsyncadd (%p1554_p8), %s1354_s15, 4294967280  ;;  %p15_p9 = scmp.ge.s32.totalorder %s1774_s24, 5   ;;  %s2489_s18 = smov %s1709_s19 }
 0x2cc   : > { %s2490_s19 = smov %s1713_s20  ;;  %s2491_s20 = smov %s1785_s27 }
 0x2cd   : > { %s2492_s21 = smov %s1774_s24  ;;  %17 = sbr.rel (!%p15_p9) target bundleno = 3 (0x3), region = 75 }
 0x2d2   :  { %1359 = vsyncpa [#allocation3], 1 }
 0x2d3   :  { %1361 = vsyncpa [#allocation3 + $0x1], 1 }

</bundles_post_ra>
